<compile_context>
chip_gen: v5e
topology: v5e:2x2
jax: 0.10.0
libtpu: 0.0.40
codegen_flags: <defaults>
</compile_context>

<pallas_src>
import functools
import math

import jax
import jax.numpy as jnp
from jax import lax
from jax.experimental import pallas as pl
from jax.experimental.pallas import tpu as pltpu


# --------------------------- VMEM budget / row-tile picking -----------------------------
def _vmem_budget_bytes():
    try:
        cap = int(pltpu.get_tpu_info().vmem_capacity_bytes)
    except Exception:
        cap = 64 * 1024 * 1024          # conservative fallback (v7x-sized)
    # Leave compiler-internal-scratch headroom: ~90 MiB on 128 MiB parts, ~45 MiB on v7x.
    return max(24 * 1024 * 1024, int(0.7 * cap))


def _vmem_estimate_bytes(k, W, cin, cf):
    """Per-grid-step VMEM estimate: double-buffered pipeline blocks + in-kernel slabs."""
    tb = 2 * k
    f32, bf16 = 4, 2
    bufs = 2 * (tb * W * cin * f32 + 2 * W * cin * f32       # low cur + 2 halo rows
                + k * W * cf * bf16 + 2 * W * cf * bf16      # high (W-upsampled, bf16)
                + tb * W * cf * f32)                         # output
    wts = 2 * (cin * cf * bf16 + 9 * cf * cf * bf16 + 2 * cf * f32)
    tmp = ((tb + 2) * W * cf * f32                           # lateral (f32)
           + (k + 2) * W * cf * f32                          # upsample base (f32)
           + (tb + 2) * (W + 2) * cf * bf16                  # padded fused slab (bf16)
           + 2 * tb * (W + 2) * 3 * cf * bf16                # xcat + one live slice (bf16)
           + tb * W * cf * f32)                              # f32 accumulator
    return bufs + wts + int(1.5 * tmp)


def _pick_k(H2, W, cin, cf, budget, max_k=None):
    """k = top-down rows per tile (output tile = 2k rows)."""
    cap = H2 if max_k is None else max(1, min(int(max_k), H2))
    kmax = 1
    for cand in range(1, cap + 1):
        if _vmem_estimate_bytes(cand, W, cin, cf) <= budget:
            kmax = cand
        else:
            break
    # Prefer an exact divisor of H2 (no partial tail tile) unless that shrinks the tile to
    # less than half the VMEM-optimal size; otherwise use cdiv (tail handled by masking).
    kdiv = 1
    for d in range(1, kmax + 1):
        if H2 % d == 0:
            kdiv = d
    return kdiv if 2 * kdiv >= kmax else kmax


# ------------------------------- Fused FPN-path kernel ----------------------------------
def fpn_path_fused(low, high, w1_bf, b1, w3kx_bf, b3, *, max_k=None):
    """low: (N,H,W,Cin) f32, high: (N,H/2,W/2,Cf) f32 -> (N,H,W,Cf) f32 (NHWC)."""
    N, H, W, cin = low.shape
    Nh, H2, W2, cf = high.shape
    assert Nh == N and H == 2 * H2 and W == 2 * W2

    # W-direction nearest-x2 of the (quarter-res) top-down map, done once by XLA in bf16.
    # TODO(synk): fold this into the kernel (needs a packed->unpacked VMEM relayout).
    high_w = jnp.repeat(high, 2, axis=2).astype(jnp.bfloat16)        # (N, H2, W, cf)

    budget = _vmem_budget_bytes()
    k = _pick_k(H2, W, cin, cf, budget, max_k=max_k)
    tb = 2 * k                                  # output rows per grid step (even)
    nt = pl.cdiv(H2, k)

    def kernel(lc_ref, lp_ref, ln_ref, hc_ref, hp_ref, hn_ref,
               w1_ref, b1_ref, w3_ref, b3_ref, o_ref):
        # lc_ref: (1, tb, W, cin)  low rows [i*tb, i*tb+tb)
        # lp_ref/ln_ref: (1, 1, W, cin)  low halo rows (clamped; masked by row validity)
        # hc_ref: (1, k, W, cf)  bf16 W-upsampled top-down rows [i*k, i*k+k)
        # hp_ref/hn_ref: (1, 1, W, cf)  bf16 top-down halo rows
        # w1_ref: (cin, cf) bf16, b1_ref: (1, cf) f32
        # w3_ref: (3, 3*cf, cf) bf16 (per-kx, ky-major K), b3_ref: (1, cf) f32
        # o_ref : (1, tb, W, cf) f32
        i = pl.program_id(1)
        r0 = i * tb                                    # first output row of this tile

        w1 = w1_ref[...]
        b1v = b1_ref[...]

        def lat1x1(x):                                 # (m, W, cin) f32 -> (m, W, cf) f32
            m = x.shape[0]
            y = jnp.dot(x.reshape(m * W, cin).astype(jnp.bfloat16), w1,
                        preferred_element_type=jnp.float32)
            return y.reshape(m, W, cf)

        # Lateral 1x1 conv (bf16 MXU operands, f32 accumulate) for the tb output rows plus
        # the two halo rows -- recomputed here so the fused map never touches HBM.
        lat_mid = lat1x1(lc_ref[0])                    # (tb, W, cf)
        lat_top = lat1x1(lp_ref[0])                    # (1, W, cf)
        lat_bot = lat1x1(ln_ref[0])                    # (1, W, cf)

        # base = upsampled top-down + bias, computed once (bias folded into the add).
        up_mid = hc_ref[0] + b1v                       # (k, W, cf) f32
        up_top = hp_ref[0] + b1v                       # (1, W, cf)
        up_bot = hn_ref[0] + b1v

        # Nearest-x2 in H: each top-down row feeds a pair of lateral rows -> free leading
        # reshape of lat + broadcast add (no repeated tensor is materialized).
        f_mid = (lat_mid.reshape(k, 2, W, cf) + up_mid[:, None]).reshape(tb, W, cf)
        f_top = lat_top + up_top
        f_bot = lat_bot + up_bot

        fused = jnp.concatenate([f_top, f_mid, f_bot], axis=0)       # (tb+2, W, cf) f32
        # Row-validity mask: zero-pads the 3x3 conv at the image top/bottom and kills
        # garbage rows of partial tail tiles (jnp.where -> no NaN/Inf leak from halos).
        gr = r0 - 1 + lax.broadcasted_iota(jnp.int32, (tb + 2, 1, 1), 0)
        fused = jnp.where((gr >= 0) & (gr < H), fused, 0.0).astype(jnp.bfloat16)

        # Single column-zero-padded bf16 slab; ky slabs concatenated along channels
        # (K = 3*cf), the three kx taps are fed from static column slices of it.
        zc = jnp.zeros((tb + 2, 1, cf), jnp.bfloat16)
        fpad = jnp.concatenate([zc, fused, zc], axis=1)               # (tb+2, W+2, cf)
        xcat = jnp.concatenate(
            [fpad[0:tb], fpad[1:tb + 1], fpad[2:tb + 2]], axis=-1)    # (tb, W+2, 3cf)

        rows = tb * W
        acc = jnp.dot(xcat[:, 0:W, :].reshape(rows, 3 * cf), w3_ref[0],
                      preferred_element_type=jnp.float32)
        acc = acc + jnp.dot(xcat[:, 1:W + 1, :].reshape(rows, 3 * cf), w3_ref[1],
                            preferred_element_type=jnp.float32)
        acc = acc + jnp.dot(xcat[:, 2:W + 2, :].reshape(rows, 3 * cf), w3_ref[2],
                            preferred_element_type=jnp.float32)
        o_ref[0] = (acc + b3_ref[...]).reshape(tb, W, cf).astype(o_ref.dtype)

    in_specs = [
        pl.BlockSpec((1, tb, W, cin), lambda n, i: (n, i, 0, 0)),                # low cur
        pl.BlockSpec((1, 1, W, cin),
                     lambda n, i: (n, jnp.maximum(i * tb - 1, 0), 0, 0)),        # low prev
        pl.BlockSpec((1, 1, W, cin),
                     lambda n, i: (n, jnp.minimum(i * tb + tb, H - 1), 0, 0)),   # low next
        pl.BlockSpec((1, k, W, cf), lambda n, i: (n, i, 0, 0)),                  # high cur
        pl.BlockSpec((1, 1, W, cf),
                     lambda n, i: (n, jnp.maximum(i * k - 1, 0), 0, 0)),         # high prev
        pl.BlockSpec((1, 1, W, cf),
                     lambda n, i: (n, jnp.minimum(i * k + k, H2 - 1), 0, 0)),    # high next
        pl.BlockSpec((cin, cf), lambda n, i: (0, 0)),                            # w1 (bf16)
        pl.BlockSpec((1, cf), lambda n, i: (0, 0)),                              # b1
        pl.BlockSpec((3, 3 * cf, cf), lambda n, i: (0, 0, 0)),                   # w3 (bf16)
        pl.BlockSpec((1, cf), lambda n, i: (0, 0)),                              # b3
    ]
    out_specs = pl.BlockSpec((1, tb, W, cf), lambda n, i: (n, i, 0, 0))

    return pl.pallas_call(
        kernel,
        out_shape=jax.ShapeDtypeStruct((N, H, W, cf), jnp.float32),
        grid_spec=pltpu.PrefetchScalarGridSpec(
            num_scalar_prefetch=0,
            grid=(N, nt),
            in_specs=in_specs,
            out_specs=out_specs,
        ),
        compiler_params=pltpu.CompilerParams(
            dimension_semantics=("parallel", "parallel"),
            vmem_limit_bytes=int(budget),
        ),
    )(low, low, low, high_w, high_w, high_w, w1_bf, b1, w3kx_bf, b3)


# ----------------------------------- Module wrapper -------------------------------------
class FPNPathPallas:
    """Pallas implementation of FPNPath. Inputs/outputs are NCHW like PyTorch."""

    def __init__(self, low_channels, feature_dims, key):
        k1, k2, k3, k4 = jax.random.split(key, 4)
        # PyTorch Conv2d default init: U(-1/sqrt(fan_in), 1/sqrt(fan_in)) for weight & bias.
        bound1 = 1.0 / math.sqrt(low_channels * 1 * 1)
        bound3 = 1.0 / math.sqrt(feature_dims * 3 * 3)
        # lateral 1x1: stored (Cin, Cf) for the NHWC matmul.
        self.w1 = jax.random.uniform(k1, (low_channels, feature_dims), jnp.float32,
                                     -bound1, bound1)
        self.b1 = jax.random.uniform(k2, (1, feature_dims), jnp.float32, -bound1, bound1)
        # 3x3: stored HWIO (ky, kx, Cin, Cout) as the f32 master.
        self.w3 = jax.random.uniform(k3, (3, 3, feature_dims, feature_dims), jnp.float32,
                                     -bound3, bound3)
        self.b3 = jax.random.uniform(k4, (1, feature_dims), jnp.float32, -bound3, bound3)
        # bf16 MXU copies: (kx, ky*Cin, Cout) with the 3 ky taps stacked ky-major along K,
        # matching the in-kernel channel concat [row h-1 | row h | row h+1].
        self.w1_bf = self.w1.astype(jnp.bfloat16)
        self.w3_kx_bf = jnp.transpose(self.w3, (1, 0, 2, 3)).reshape(
            3, 3 * feature_dims, feature_dims).astype(jnp.bfloat16)
        self.feature_dims = feature_dims

    @functools.partial(jax.jit, static_argnums=0)
    def __call__(self, low_nchw, high_nchw):
        # NCHW -> NHWC at the module boundary (interface glue).
        low = jnp.transpose(low_nchw, (0, 2, 3, 1))      # (N, H, W, Cin)
        high = jnp.transpose(high_nchw, (0, 2, 3, 1))    # (N, H/2, W/2, Cf)
        p = fpn_path_fused(low, high, self.w1_bf, self.b1, self.w3_kx_bf, self.b3)
        return jnp.transpose(p, (0, 3, 1, 2))            # back to NCHW


# ------------------------------- Reference (pure JAX) -----------------------------------
def reference_fpn_path(low_nchw, high_nchw, mod: FPNPathPallas):
    low = jnp.transpose(low_nchw, (0, 2, 3, 1))
    high = jnp.transpose(high_nchw, (0, 2, 3, 1))
    lat = lax.conv_general_dilated(
        low, mod.w1[None, None], (1, 1), "VALID",
        dimension_numbers=("NHWC", "HWIO", "NHWC"),
        precision=lax.Precision.HIGHEST) + mod.b1[0]
    up = jnp.repeat(jnp.repeat(high, 2, axis=1), 2, axis=2)
    x = lat + up
    out = lax.conv_general_dilated(
        x, mod.w3, (1, 1), "SAME",
        dimension_numbers=("NHWC", "HWIO", "NHWC"),
        precision=lax.Precision.HIGHEST) + mod.b3[0]
    return jnp.transpose(out, (0, 3, 1, 2))


if __name__ == "__main__":
    key = jax.random.PRNGKey(0)
    k_low, k_high, k_param = jax.random.split(key, 3)

    N, low_channels, H, W = 2, 4, 16, 16
    feature_dims = 32

    low = jax.random.normal(k_low, (N, low_channels, H, W), jnp.float32)
    high = jax.random.normal(k_high, (N, feature_dims, H // 2, W // 2), jnp.float32)

    mod = FPNPathPallas(low_channels, feature_dims, k_param)

    out = jax.block_until_ready(mod(low, high))
    ref = jax.block_until_ready(reference_fpn_path(low, high, mod))

    assert out.shape == (N, feature_dims, H, W)
    max_err = float(jnp.max(jnp.abs(out - ref)))
    # bf16 MXU operands (f32 accumulate) vs. an f32 HIGHEST-precision reference.
    assert jnp.allclose(out, ref, atol=3e-2, rtol=3e-2), max_err

    # Multi-tile path (forced small row tile): exercises the halo-row index maps and the
    # top/bottom zero-padding masks across tile boundaries.
    low_nhwc = jnp.transpose(low, (0, 2, 3, 1))
    high_nhwc = jnp.transpose(high, (0, 2, 3, 1))
    out2 = fpn_path_fused(low_nhwc, high_nhwc, mod.w1_bf, mod.b1, mod.w3_kx_bf, mod.b3,
                          max_k=2)
    out2 = jax.block_until_ready(jnp.transpose(out2, (0, 3, 1, 2)))
    max_err2 = float(jnp.max(jnp.abs(out2 - ref)))
    assert jnp.allclose(out2, ref, atol=3e-2, rtol=3e-2), max_err2

    print("KERNEL_OK")
</pallas_src>

<mosaic_0001>
module attributes {stable_mosaic.version = 11 : i64} {
  func.func @kernel(%arg0: i32, %arg1: i32, %arg2: memref<1x16x16x4xf32, #tpu.memory_space<vmem>>, %arg3: memref<1x1x16x4xf32, #tpu.memory_space<vmem>>, %arg4: memref<1x1x16x4xf32, #tpu.memory_space<vmem>>, %arg5: memref<1x8x16x32xbf16, #tpu.memory_space<vmem>>, %arg6: memref<1x1x16x32xbf16, #tpu.memory_space<vmem>>, %arg7: memref<1x1x16x32xbf16, #tpu.memory_space<vmem>>, %arg8: memref<4x32xbf16, #tpu.memory_space<vmem>>, %arg9: memref<1x32xf32, #tpu.memory_space<vmem>>, %arg10: memref<3x96x32xbf16, #tpu.memory_space<vmem>>, %arg11: memref<1x32xf32, #tpu.memory_space<vmem>>, %arg12: memref<1x16x16x32xf32, #tpu.memory_space<vmem>>) attributes {dimension_semantics = [#tpu.dimension_semantics<parallel>, #tpu.dimension_semantics<parallel>], iteration_bounds = array<i64: 2, 1>, scalar_prefetch = 0 : i64, scratch_operands = 0 : i64, tpu.core_type = #tpu.core_type<tc>, window_params = [{transform_indices = @transform_0, window_bounds = array<i64: 1, 16, 16, 4>}, {transform_indices = @transform_1, window_bounds = array<i64: 1, 1, 16, 4>}, {transform_indices = @transform_2, window_bounds = array<i64: 1, 1, 16, 4>}, {transform_indices = @transform_3, window_bounds = array<i64: 1, 8, 16, 32>}, {transform_indices = @transform_4, window_bounds = array<i64: 1, 1, 16, 32>}, {transform_indices = @transform_5, window_bounds = array<i64: 1, 1, 16, 32>}, {pipeline_mode = #tpu.pipeline_mode<synchronous>, transform_indices = @transform_6, window_bounds = array<i64: 4, 32>}, {pipeline_mode = #tpu.pipeline_mode<synchronous>, transform_indices = @transform_7, window_bounds = array<i64: 1, 32>}, {pipeline_mode = #tpu.pipeline_mode<synchronous>, transform_indices = @transform_8, window_bounds = array<i64: 3, 96, 32>}, {pipeline_mode = #tpu.pipeline_mode<synchronous>, transform_indices = @transform_9, window_bounds = array<i64: 1, 32>}, {transform_indices = @transform_10, window_bounds = array<i64: 1, 16, 16, 32>}]} {
    %c16_i32 = arith.constant 16 : i32
    %0 = arith.muli %arg1, %c16_i32 : i32
    %c0 = arith.constant 0 : index
    %c0_0 = arith.constant 0 : index
    %1 = vector.load %arg8[%c0, %c0_0] : memref<4x32xbf16, #tpu.memory_space<vmem>>, vector<4x32xbf16>
    %c0_1 = arith.constant 0 : index
    %c0_2 = arith.constant 0 : index
    %2 = vector.load %arg9[%c0_1, %c0_2] : memref<1x32xf32, #tpu.memory_space<vmem>>, vector<1x32xf32>
    %c0_3 = arith.constant 0 : index
    %c0_4 = arith.constant 0 : index
    %c0_5 = arith.constant 0 : index
    %c0_6 = arith.constant 0 : index
    %3 = vector.load %arg2[%c0_3, %c0_4, %c0_5, %c0_6] : memref<1x16x16x4xf32, #tpu.memory_space<vmem>>, vector<1x16x16x4xf32>
    %4 = vector.shape_cast %3 : vector<1x16x16x4xf32> to vector<16x16x4xf32>
    %5 = vector.shape_cast %4 : vector<16x16x4xf32> to vector<256x4xf32>
    %6 = arith.truncf %5 : vector<256x4xf32> to vector<256x4xbf16>
    %cst = arith.constant dense<0.000000e+00> : vector<256x32xf32>
    %7 = tpu.matmul %6, %1, %cst {dimension_numbers = #tpu.dot_dimension_numbers<[1], [0], [0], [1], [0, 0, 1, 1], [], []>} : vector<256x4xbf16>, vector<4x32xbf16>, vector<256x32xf32> -> vector<256x32xf32>
    %8 = vector.shape_cast %7 : vector<256x32xf32> to vector<16x16x32xf32>
    %c0_7 = arith.constant 0 : index
    %c0_8 = arith.constant 0 : index
    %c0_9 = arith.constant 0 : index
    %c0_10 = arith.constant 0 : index
    %9 = vector.load %arg3[%c0_7, %c0_8, %c0_9, %c0_10] : memref<1x1x16x4xf32, #tpu.memory_space<vmem>>, vector<1x1x16x4xf32>
    %10 = vector.shape_cast %9 : vector<1x1x16x4xf32> to vector<1x16x4xf32>
    %11 = vector.shape_cast %10 : vector<1x16x4xf32> to vector<16x4xf32>
    %12 = arith.truncf %11 : vector<16x4xf32> to vector<16x4xbf16>
    %cst_11 = arith.constant dense<0.000000e+00> : vector<16x32xf32>
    %13 = tpu.matmul %12, %1, %cst_11 {dimension_numbers = #tpu.dot_dimension_numbers<[1], [0], [0], [1], [0, 0, 1, 1], [], []>} : vector<16x4xbf16>, vector<4x32xbf16>, vector<16x32xf32> -> vector<16x32xf32>
    %14 = vector.shape_cast %13 : vector<16x32xf32> to vector<1x16x32xf32>
    %c0_12 = arith.constant 0 : index
    %c0_13 = arith.constant 0 : index
    %c0_14 = arith.constant 0 : index
    %c0_15 = arith.constant 0 : index
    %15 = vector.load %arg4[%c0_12, %c0_13, %c0_14, %c0_15] : memref<1x1x16x4xf32, #tpu.memory_space<vmem>>, vector<1x1x16x4xf32>
    %16 = vector.shape_cast %15 : vector<1x1x16x4xf32> to vector<1x16x4xf32>
    %17 = vector.shape_cast %16 : vector<1x16x4xf32> to vector<16x4xf32>
    %18 = arith.truncf %17 : vector<16x4xf32> to vector<16x4xbf16>
    %cst_16 = arith.constant dense<0.000000e+00> : vector<16x32xf32>
    %19 = tpu.matmul %18, %1, %cst_16 {dimension_numbers = #tpu.dot_dimension_numbers<[1], [0], [0], [1], [0, 0, 1, 1], [], []>} : vector<16x4xbf16>, vector<4x32xbf16>, vector<16x32xf32> -> vector<16x32xf32>
    %20 = vector.shape_cast %19 : vector<16x32xf32> to vector<1x16x32xf32>
    %c0_17 = arith.constant 0 : index
    %c0_18 = arith.constant 0 : index
    %c0_19 = arith.constant 0 : index
    %c0_20 = arith.constant 0 : index
    %21 = vector.load %arg5[%c0_17, %c0_18, %c0_19, %c0_20] : memref<1x8x16x32xbf16, #tpu.memory_space<vmem>>, vector<1x8x16x32xbf16>
    %22 = vector.shape_cast %21 : vector<1x8x16x32xbf16> to vector<8x16x32xbf16>
    %23 = arith.extf %22 : vector<8x16x32xbf16> to vector<8x16x32xf32>
    %24 = vector.shape_cast %2 : vector<1x32xf32> to vector<1x1x32xf32>
    %25 = vector.broadcast %24 : vector<1x1x32xf32> to vector<8x16x32xf32>
    %26 = arith.addf %23, %25 : vector<8x16x32xf32>
    %c0_21 = arith.constant 0 : index
    %c0_22 = arith.constant 0 : index
    %c0_23 = arith.constant 0 : index
    %c0_24 = arith.constant 0 : index
    %27 = vector.load %arg6[%c0_21, %c0_22, %c0_23, %c0_24] : memref<1x1x16x32xbf16, #tpu.memory_space<vmem>>, vector<1x1x16x32xbf16>
    %28 = vector.shape_cast %27 : vector<1x1x16x32xbf16> to vector<1x16x32xbf16>
    %29 = arith.extf %28 : vector<1x16x32xbf16> to vector<1x16x32xf32>
    %30 = vector.shape_cast %2 : vector<1x32xf32> to vector<1x1x32xf32>
    %31 = vector.broadcast %30 : vector<1x1x32xf32> to vector<1x16x32xf32>
    %32 = arith.addf %29, %31 : vector<1x16x32xf32>
    %c0_25 = arith.constant 0 : index
    %c0_26 = arith.constant 0 : index
    %c0_27 = arith.constant 0 : index
    %c0_28 = arith.constant 0 : index
    %33 = vector.load %arg7[%c0_25, %c0_26, %c0_27, %c0_28] : memref<1x1x16x32xbf16, #tpu.memory_space<vmem>>, vector<1x1x16x32xbf16>
    %34 = vector.shape_cast %33 : vector<1x1x16x32xbf16> to vector<1x16x32xbf16>
    %35 = arith.extf %34 : vector<1x16x32xbf16> to vector<1x16x32xf32>
    %36 = vector.shape_cast %2 : vector<1x32xf32> to vector<1x1x32xf32>
    %37 = vector.broadcast %36 : vector<1x1x32xf32> to vector<1x16x32xf32>
    %38 = arith.addf %35, %37 : vector<1x16x32xf32>
    %39 = vector.shape_cast %8 : vector<16x16x32xf32> to vector<8x2x16x32xf32>
    %40 = vector.shape_cast %26 : vector<8x16x32xf32> to vector<8x1x16x32xf32>
    %41 = vector.broadcast %40 : vector<8x1x16x32xf32> to vector<8x2x16x32xf32>
    %42 = arith.addf %39, %41 : vector<8x2x16x32xf32>
    %43 = vector.shape_cast %42 : vector<8x2x16x32xf32> to vector<16x16x32xf32>
    %44 = arith.addf %14, %32 : vector<1x16x32xf32>
    %45 = arith.addf %20, %38 : vector<1x16x32xf32>
    %46 = tpu.concatenate %44, %43, %45 in 0 : vector<1x16x32xf32>, vector<16x16x32xf32>, vector<1x16x32xf32> -> vector<18x16x32xf32>
    %c1_i32 = arith.constant 1 : i32
    %47 = arith.subi %0, %c1_i32 : i32
    %48 = tpu.iota {dimensions = array<i32: 0>} : vector<18x1x1xi32>
    %49 = vector.broadcast %47 : i32 to vector<18x1x1xi32>
    %50 = arith.addi %49, %48 : vector<18x1x1xi32>
    %c0_i32 = arith.constant 0 : i32
    %51 = vector.broadcast %c0_i32 : i32 to vector<18x1x1xi32>
    %52 = arith.cmpi sge, %50, %51 : vector<18x1x1xi32>
    %c16_i32_29 = arith.constant 16 : i32
    %53 = vector.broadcast %c16_i32_29 : i32 to vector<18x1x1xi32>
    %54 = arith.cmpi slt, %50, %53 : vector<18x1x1xi32>
    %55 = arith.andi %52, %54 : vector<18x1x1xi1>
    %cst_30 = arith.constant 0.000000e+00 : f32
    %56 = vector.shape_cast %55 : vector<18x1x1xi1> to vector<18x1x1xi1>
    %57 = vector.broadcast %56 : vector<18x1x1xi1> to vector<18x16x32xi1>
    %58 = vector.broadcast %cst_30 : f32 to vector<18x16x32xf32>
    %59 = arith.select %57, %46, %58 : vector<18x16x32xi1>, vector<18x16x32xf32>
    %60 = arith.truncf %59 : vector<18x16x32xf32> to vector<18x16x32xbf16>
    %cst_31 = arith.constant 0.000000e+00 : bf16
    %61 = vector.broadcast %cst_31 : bf16 to vector<18x1x32xbf16>
    %62 = tpu.concatenate %61, %60, %61 in 1 : vector<18x1x32xbf16>, vector<18x16x32xbf16>, vector<18x1x32xbf16> -> vector<18x18x32xbf16>
    %63 = vector.extract_strided_slice %62 {offsets = [0, 0, 0], sizes = [16, 18, 32], strides = [1, 1, 1]} : vector<18x18x32xbf16> to vector<16x18x32xbf16>
    %64 = vector.extract_strided_slice %62 {offsets = [1, 0, 0], sizes = [16, 18, 32], strides = [1, 1, 1]} : vector<18x18x32xbf16> to vector<16x18x32xbf16>
    %65 = vector.extract_strided_slice %62 {offsets = [2, 0, 0], sizes = [16, 18, 32], strides = [1, 1, 1]} : vector<18x18x32xbf16> to vector<16x18x32xbf16>
    %66 = tpu.concatenate %63, %64, %65 in 2 : vector<16x18x32xbf16>, vector<16x18x32xbf16>, vector<16x18x32xbf16> -> vector<16x18x96xbf16>
    %67 = vector.extract_strided_slice %66 {offsets = [0, 0, 0], sizes = [16, 16, 96], strides = [1, 1, 1]} : vector<16x18x96xbf16> to vector<16x16x96xbf16>
    %68 = vector.shape_cast %67 : vector<16x16x96xbf16> to vector<256x96xbf16>
    %c0_32 = arith.constant 0 : index
    %c0_33 = arith.constant 0 : index
    %c0_34 = arith.constant 0 : index
    %69 = vector.load %arg10[%c0_32, %c0_33, %c0_34] : memref<3x96x32xbf16, #tpu.memory_space<vmem>>, vector<1x96x32xbf16>
    %70 = vector.shape_cast %69 : vector<1x96x32xbf16> to vector<96x32xbf16>
    %cst_35 = arith.constant dense<0.000000e+00> : vector<256x32xf32>
    %71 = tpu.matmul %68, %70, %cst_35 {dimension_numbers = #tpu.dot_dimension_numbers<[1], [0], [0], [1], [0, 0, 1, 1], [], []>} : vector<256x96xbf16>, vector<96x32xbf16>, vector<256x32xf32> -> vector<256x32xf32>
    %72 = vector.extract_strided_slice %66 {offsets = [0, 1, 0], sizes = [16, 16, 96], strides = [1, 1, 1]} : vector<16x18x96xbf16> to vector<16x16x96xbf16>
    %73 = vector.shape_cast %72 : vector<16x16x96xbf16> to vector<256x96xbf16>
    %c1 = arith.constant 1 : index
    %c0_36 = arith.constant 0 : index
    %c0_37 = arith.constant 0 : index
    %74 = vector.load %arg10[%c1, %c0_36, %c0_37] : memref<3x96x32xbf16, #tpu.memory_space<vmem>>, vector<1x96x32xbf16>
    %75 = vector.shape_cast %74 : vector<1x96x32xbf16> to vector<96x32xbf16>
    %cst_38 = arith.constant dense<0.000000e+00> : vector<256x32xf32>
    %76 = tpu.matmul %73, %75, %cst_38 {dimension_numbers = #tpu.dot_dimension_numbers<[1], [0], [0], [1], [0, 0, 1, 1], [], []>} : vector<256x96xbf16>, vector<96x32xbf16>, vector<256x32xf32> -> vector<256x32xf32>
    %77 = arith.addf %71, %76 : vector<256x32xf32>
    %78 = vector.extract_strided_slice %66 {offsets = [0, 2, 0], sizes = [16, 16, 96], strides = [1, 1, 1]} : vector<16x18x96xbf16> to vector<16x16x96xbf16>
    %79 = vector.shape_cast %78 : vector<16x16x96xbf16> to vector<256x96xbf16>
    %c2 = arith.constant 2 : index
    %c0_39 = arith.constant 0 : index
    %c0_40 = arith.constant 0 : index
    %80 = vector.load %arg10[%c2, %c0_39, %c0_40] : memref<3x96x32xbf16, #tpu.memory_space<vmem>>, vector<1x96x32xbf16>
    %81 = vector.shape_cast %80 : vector<1x96x32xbf16> to vector<96x32xbf16>
    %cst_41 = arith.constant dense<0.000000e+00> : vector<256x32xf32>
    %82 = tpu.matmul %79, %81, %cst_41 {dimension_numbers = #tpu.dot_dimension_numbers<[1], [0], [0], [1], [0, 0, 1, 1], [], []>} : vector<256x96xbf16>, vector<96x32xbf16>, vector<256x32xf32> -> vector<256x32xf32>
    %83 = arith.addf %77, %82 : vector<256x32xf32>
    %c0_42 = arith.constant 0 : index
    %c0_43 = arith.constant 0 : index
    %84 = vector.load %arg11[%c0_42, %c0_43] : memref<1x32xf32, #tpu.memory_space<vmem>>, vector<1x32xf32>
    %85 = vector.broadcast %84 : vector<1x32xf32> to vector<256x32xf32>
    %86 = arith.addf %83, %85 : vector<256x32xf32>
    %87 = vector.shape_cast %86 : vector<256x32xf32> to vector<16x16x32xf32>
    %c0_44 = arith.constant 0 : index
    %c0_45 = arith.constant 0 : index
    %c0_46 = arith.constant 0 : index
    %c0_47 = arith.constant 0 : index
    %88 = vector.load %arg12[%c0_44, %c0_45, %c0_46, %c0_47] : memref<1x16x16x32xf32, #tpu.memory_space<vmem>>, vector<1x16x16x32xf32>
    %89 = vector.shape_cast %88 : vector<1x16x16x32xf32> to vector<16x16x32xf32>
    %90 = vector.shape_cast %87 : vector<16x16x32xf32> to vector<1x16x16x32xf32>
    tpu.vector_store %arg12[%c0_44, %c0_45, %c0_46, %c0_47], %90 {strides = array<i32>} : memref<1x16x16x32xf32, #tpu.memory_space<vmem>>, vector<1x16x16x32xf32>,
    return
  }
  func.func @transform_0(%arg0: i32, %arg1: i32) -> (i32, i32, i32, i32) {
    %c0_i32 = arith.constant 0 : i32
    %c0_i32_0 = arith.constant 0 : i32
    %c0_i32_1 = arith.constant 0 : i32
    return %arg0, %arg1, %c0_i32, %c0_i32_0 : i32, i32, i32, i32
  }
  func.func @transform_1(%arg0: i32, %arg1: i32) -> (i32, i32, i32, i32) {
    %c16_i32 = arith.constant 16 : i32
    %0 = arith.muli %arg1, %c16_i32 : i32
    %c1_i32 = arith.constant 1 : i32
    %1 = arith.subi %0, %c1_i32 : i32
    %c0_i32 = arith.constant 0 : i32
    %2 = arith.maxsi %1, %c0_i32 : i32
    %c0_i32_0 = arith.constant 0 : i32
    %c0_i32_1 = arith.constant 0 : i32
    %c0_i32_2 = arith.constant 0 : i32
    return %arg0, %2, %c0_i32_0, %c0_i32_1 : i32, i32, i32, i32
  }
  func.func @transform_2(%arg0: i32, %arg1: i32) -> (i32, i32, i32, i32) {
    %c16_i32 = arith.constant 16 : i32
    %0 = arith.muli %arg1, %c16_i32 : i32
    %c16_i32_0 = arith.constant 16 : i32
    %1 = arith.addi %0, %c16_i32_0 : i32
    %c15_i32 = arith.constant 15 : i32
    %2 = arith.minsi %1, %c15_i32 : i32
    %c0_i32 = arith.constant 0 : i32
    %c0_i32_1 = arith.constant 0 : i32
    %c0_i32_2 = arith.constant 0 : i32
    return %arg0, %2, %c0_i32, %c0_i32_1 : i32, i32, i32, i32
  }
  func.func @transform_3(%arg0: i32, %arg1: i32) -> (i32, i32, i32, i32) {
    %c0_i32 = arith.constant 0 : i32
    %c0_i32_0 = arith.constant 0 : i32
    %c0_i32_1 = arith.constant 0 : i32
    return %arg0, %arg1, %c0_i32, %c0_i32_0 : i32, i32, i32, i32
  }
  func.func @transform_4(%arg0: i32, %arg1: i32) -> (i32, i32, i32, i32) {
    %c8_i32 = arith.constant 8 : i32
    %0 = arith.muli %arg1, %c8_i32 : i32
    %c1_i32 = arith.constant 1 : i32
    %1 = arith.subi %0, %c1_i32 : i32
    %c0_i32 = arith.constant 0 : i32
    %2 = arith.maxsi %1, %c0_i32 : i32
    %c0_i32_0 = arith.constant 0 : i32
    %c0_i32_1 = arith.constant 0 : i32
    %c0_i32_2 = arith.constant 0 : i32
    return %arg0, %2, %c0_i32_0, %c0_i32_1 : i32, i32, i32, i32
  }
  func.func @transform_5(%arg0: i32, %arg1: i32) -> (i32, i32, i32, i32) {
    %c8_i32 = arith.constant 8 : i32
    %0 = arith.muli %arg1, %c8_i32 : i32
    %c8_i32_0 = arith.constant 8 : i32
    %1 = arith.addi %0, %c8_i32_0 : i32
    %c7_i32 = arith.constant 7 : i32
    %2 = arith.minsi %1, %c7_i32 : i32
    %c0_i32 = arith.constant 0 : i32
    %c0_i32_1 = arith.constant 0 : i32
    %c0_i32_2 = arith.constant 0 : i32
    return %arg0, %2, %c0_i32, %c0_i32_1 : i32, i32, i32, i32
  }
  func.func @transform_6(%arg0: i32, %arg1: i32) -> (i32, i32) {
    %c0_i32 = arith.constant 0 : i32
    %c0_i32_0 = arith.constant 0 : i32
    %c0_i32_1 = arith.constant 0 : i32
    return %c0_i32, %c0_i32_0 : i32, i32
  }
  func.func @transform_7(%arg0: i32, %arg1: i32) -> (i32, i32) {
    %c0_i32 = arith.constant 0 : i32
    %c0_i32_0 = arith.constant 0 : i32
    %c0_i32_1 = arith.constant 0 : i32
    return %c0_i32, %c0_i32_0 : i32, i32
  }
  func.func @transform_8(%arg0: i32, %arg1: i32) -> (i32, i32, i32) {
    %c0_i32 = arith.constant 0 : i32
    %c0_i32_0 = arith.constant 0 : i32
    %c0_i32_1 = arith.constant 0 : i32
    %c0_i32_2 = arith.constant 0 : i32
    return %c0_i32, %c0_i32_0, %c0_i32_1 : i32, i32, i32
  }
  func.func @transform_9(%arg0: i32, %arg1: i32) -> (i32, i32) {
    %c0_i32 = arith.constant 0 : i32
    %c0_i32_0 = arith.constant 0 : i32
    %c0_i32_1 = arith.constant 0 : i32
    return %c0_i32, %c0_i32_0 : i32, i32
  }
  func.func @transform_10(%arg0: i32, %arg1: i32) -> (i32, i32, i32, i32) {
    %c0_i32 = arith.constant 0 : i32
    %c0_i32_0 = arith.constant 0 : i32
    %c0_i32_1 = arith.constant 0 : i32
    return %arg0, %arg1, %c0_i32, %c0_i32_0 : i32, i32, i32, i32
  }
}

</mosaic_0001>

<bundles_post_ra>
// kernel: a_call__.1
= control target key start
LH: loop header
LB: loop body
LE: loop exit
PB: predicated region body
PF: predicated region fallthrough
CT: control target
= control target key end

     0   :  { %15 = vsyncpa [#allocation3], 0  ;;  %s4151_s0 = inlined_call_operand.vmem [shape: f32[2,16,16,4], index: 0, kind: input, shape index: {}, may-alias: {0,1,2}]   ;;  %s4152_s1 = inlined_call_operand.vmem [shape: f32[2,16,16,4], index: 1, kind: input, shape index: {}, may-alias: {0,1,2}]   ;;  %s4153_s2 = inlined_call_operand.vmem [shape: f32[2,16,16,4], index: 2, kind: input, shape index: {}, may-alias: {0,1,2}]   ;;  %s4154_s3 = inlined_call_operand.vmem [shape: bf16[2,8,16,32], index: 3, kind: input, shape index: {}, may-alias: {3,4,5}]   ;;  %s4155_s4 = inlined_call_operand.vmem [shape: bf16[2,8,16,32], index: 4, kind: input, shape index: {}, may-alias: {3,4,5}]   ;;  %s4156_s5 = inlined_call_operand.vmem [shape: bf16[2,8,16,32], index: 5, kind: input, shape index: {}, may-alias: {3,4,5}]   ;;  %s4157_s6 = inlined_call_operand.vmem [shape: bf16[4,32], index: 6, kind: input, shape index: {}]   ;;  %s4158_s7 = inlined_call_operand.vmem [shape: f32[1,32], index: 7, kind: input, shape index: {}]   ;;  %s4159_s8 = inlined_call_operand.vmem [shape: bf16[3,96,32], index: 8, kind: input, shape index: {}]   ;;  %s4160_s9 = inlined_call_operand.vmem [shape: f32[1,32], index: 9, kind: input, shape index: {}]   ;;  %s4161_s10 = inlined_call_operand.hbm [shape: f32[2,16,16,32], index: 10, kind: output, shape index: {}]  }
   0x1   :  { %17 = vsyncpa [#allocation3 + $0x1], 0  ;;  %s3352_s4 = smov 0   ;;  %s3354_s5 = smov 0  }
   0x2   :  { %s3356_s13 = smov 0   ;;  %s3358_s14 = smov 0  }
   0x3   :  { %s3360_s15 = smov 0   ;;  %s3362_s16 = smov 0  }
   0x4 LB: > { %s2898_s17 = sadd.s32 4294967295, %s3290_s16   ;;  %s2899_s18 = sadd.s32 4294967294, %s3290_s16   ;;  %s3290_s16 = sphi %s3362_s16, %s23_s16   ;;  %s3286_s15 = sphi %s3360_s15, %s4173_s15   ;;  %s3282_s14 = sphi %s3358_s14, %s4172_s14   ;;  %s3278_s13 = sphi %s3356_s13, %s4171_s13   ;;  %s3274_s5 = sphi %s3354_s5, %s4170_s5   ;;  %s3270_s4 = sphi %s3352_s4, %s4169_s4  }
   0x5   : > { %s35_s19 = sadd.s32 1, %s3286_s15  ;;  %s328_s20 = sadd.s32 1, %s3278_s13 }
   0x6   : > { %p37_p0 = scmp.ge.s32.totalorder %s35_s19, 2  ;;  %p338_p1 = scmp.ne.s32.totalorder %s3278_s13, %s3274_s5 }
   0x7   : > { %p339_p2 = scmp.eq.s32.totalorder %s2898_s17, 1  ;;  %p344_p3 = scmp.ne.s32.totalorder %s3274_s5, %s3270_s4 }
   0x8   : > { %s4175_s19 = smov (%p37_p0, %s35_s19), 0  ;;  %p345_p5 = scmp.eq.s32.totalorder %s2899_s18, 1 }
   0x9   : > { %p3392_p4 = por %p339_p2, %p338_p1  ;;  %s323_s22 = ssub.s32 %s3286_s15, %s4175_s19 }
   0xa   : > { %p2902_p6 = scmp.ge.s32.totalorder %s3290_s16, 1  ;;  %p326_p7 = scmp.eq.s32.totalorder %s323_s22, 0 }
   0xb   : > { %p3399_p8 = por %p345_p5, %p344_p3  ;;  %p483_p9 = scmp.lt.s32.totalorder %s3290_s16, 3 }
   0xc   : > { %s3405_s24 = scalar_select %p326_p7, %s3278_s13, %s328_s20  }
   0xd   : > { %p484_p10 = pnand %p2902_p6, %p483_p9 }
   0xe   : > { %p589_p11 = scmp.lt.s32.totalorder (!%p484_p10), %s3282_s14, 1  ;;  %s4162_s26 = smov (!%p484_p10), 32  }
   0xf   : > { %487 = sbr.rel (%p484_p10) target bundleno = 706 (0x2c2), region = 60  ;;  %s4168_s25 = smov (!%p484_p10), 32  }
  0x14   : > { %v681_v0 = vld [vmem:[%s4157_s6] sm:$0x3]  ;;  %vm780_vm0 = vcmask 1041408   ;;  %s3412_s27 = scalar_select %p589_p11, %s3282_s14, 1  ;;  %vm731_vm1 = vcmask 31744   ;;  %vm1445_vm2 = vcmask 1040384  }
  0x15   : > { %v782_v1 = vsel %vm780_vm0, %v681_v0, 0  ;;  %v3459_v30 = vld [vmem:[%s4158_s7] ss:$0 sm:$0xff]  ;;  %vm1446_vm3 = vsmask.f32 256  ;;  %vm1646_vm5 = vcmask 261120  }
  0x16   : > { %791 = vmatpush.bf16.msra.mxu0 %v782_v1  ;;  %906 = vmatpush.bf16.msra.mxu2 %v782_v1  ;;  %s3415_s28 = sshll.u32 %s3412_s27, 8  ;;  %s3087_s12 = sshll.u32 %s3412_s27, 6  ;;  %vm3466_vm4 = vmand %vm1445_vm2, %vm1446_vm3  ;;  %vm1743_vm6 = vcmask 523264   ;;  %vm2030_vm7 = vcmask 785408   ;;  %vm2357_vm8 = vcmask 1046528  }
  0x17   : > { %s3421_s11 = scalar_lea.vmem %s4151_s0, %s3415_s28  ;;  %s3451_s20 = scalar_lea.vmem %s4154_s3, %s3087_s12  ;;  %vm1820_vm9 = vsmask.f32 7424 }
  0x18   : > { %v683_v2 = vld [vmem:[%s3421_s11] sm:$0xff]  ;;  %v684_v3 = vld [vmem:[%s3421_s11 + $0x8] sm:$0xff]  ;;  %v685_v5 = vld [vmem:[%s3421_s11 + $0x10] sm:$0xff]  ;;  %s3293_s27 = smov 64   ;;  %s3086_s12 = sadd.s32 240, %s3415_s28 }
  0x19   : > { %v715_v4 = vpack.c.bf16 %v684_v3, %v683_v2  ;;  %v686_v6 = vld [vmem:[%s3421_s11 + $0x18] sm:$0xff]  ;;  %v687_v8 = vld [vmem:[%s3421_s11 + $0x20] sm:$0xff]  ;;  %v688_v9 = vld [vmem:[%s3421_s11 + $0x28] sm:$0xff]  ;;  %s628_s17 = scalar_lea.vmem %s4153_s2, %s3086_s12  ;;  %s611_s22 = scalar_lea.vmem %s4152_s1, %s3415_s28 }
  0x1a   : > { %886 = vmatpush.bf16.msrb.mxu0 %v782_v1  ;;  %v716_v7 = vpack.c.bf16 %v686_v6, %v685_v5  ;;  %v717_v10 = vpack.c.bf16 %v688_v9, %v687_v8  ;;  %v689_v11 = vld [vmem:[%s3421_s11 + $0x30] sm:$0xff]  ;;  %v690_v12 = vld [vmem:[%s3421_s11 + $0x38] sm:$0xff]  ;;  %v691_v14 = vld [vmem:[%s3421_s11 + $0x40] sm:$0xff]  ;;  %s3109_s28 = sshll.u32 %s3282_s14, 8 }
  0x1b   : > { %2916 = vmatmul.msk.bf16.vlgmr.msra.gmra.mxu0 %vm731_vm1, %v715_v4  ;;  %v718_v13 = vpack.c.bf16 %v690_v12, %v689_v11  ;;  %v692_v15 = vld [vmem:[%s3421_s11 + $0x48] sm:$0xff]  ;;  %v693_v17 = vld [vmem:[%s3421_s11 + $0x50] sm:$0xff]  ;;  %v694_v18 = vld [vmem:[%s3421_s11 + $0x58] sm:$0xff]  ;;  %s2707_s29 = scalar_lea.hbm %s4161_s10, %s3109_s28  ;;  %s3232_s28 = scalar_lea.hbm %s4161_s10, 512 }
  0x1c   : > { %v719_v16 = vpack.c.bf16 %v692_v15, %v691_v14  ;;  %v720_v19 = vpack.c.bf16 %v694_v18, %v693_v17  ;;  %v695_v20 = vld [vmem:[%s3421_s11 + $0x60] sm:$0xff]  ;;  %v696_v21 = vld [vmem:[%s3421_s11 + $0x68] sm:$0xff]  ;;  %v697_v23 = vld [vmem:[%s3421_s11 + $0x70] sm:$0xff] }
  0x1d   : > { %v721_v22 = vpack.c.bf16 %v696_v21, %v695_v20  ;;  %v698_v24 = vld [vmem:[%s3421_s11 + $0x78] sm:$0xff]  ;;  %v3111_v26 = vld [vmem:[%s3451_s20] sm:$0xff]   ;;  %v700_v28 = vld [vmem:[%s3421_s11 + $0x88] sm:$0xff] }
  0x1e   : > { %v722_v25 = vpack.c.bf16 %v698_v24, %v697_v23  ;;  %v699_v27 = vld [vmem:[%s3421_s11 + $0x80] sm:$0xff]  ;;  %v3112_v29 = vunpack.c.l.bf16 %v3111_v26  ;;  %v3113_v34 = vunpack.c.h.bf16 %v3111_v26  ;;  %v701_v41 = vld [vmem:[%s3421_s11 + $0x90] sm:$0xff]  ;;  %v702_v42 = vld [vmem:[%s3421_s11 + $0x98] sm:$0xff] }
  0x1f   : > { %v723_v31 = vpack.c.bf16 %v700_v28, %v699_v27  ;;  %v724_v46 = vpack.c.bf16 %v702_v42, %v701_v41  ;;  %v3143_v59 = vld [vmem:[%s3451_s20 + $0x8] sm:$0xff]   ;;  %v703_v61 = vld [vmem:[%s3421_s11 + $0xa0] sm:$0xff]  ;;  %v706_v20 = vld [vmem:[%s3421_s11 + $0xb8] sm:$0xff] }
  0x20   : > { %v948_v33 = vadd.f32 %v3459_v30, %v3112_v29  ;;  %v949_v36 = vadd.f32 %v3459_v30, %v3113_v34  ;;  %v704_v62 = vld [vmem:[%s3421_s11 + $0xa8] sm:$0xff]  ;;  %v3116_v1 = vunpack.c.l.bf16 %v3143_v59 }
  0x21   : > { %v725_v3 = vpack.c.bf16 %v704_v62, %v703_v61 }
  0x22   : > { %v950_v5 = vadd.f32 %v3459_v30, %v3116_v1  ;;  %v710_v1 = vld [vmem:[%s3421_s11 + $0xd8] sm:$0xff] }
  0x2b   : > { %2917 = vmatmul.msk.bf16.gmra.mxu0 %vm731_vm1, %v716_v7  ;;  %v3117_v7 = vunpack.c.h.bf16 %v3143_v59 }
  0x3b   : > { %2918 = vmatmul.msk.bf16.gmra.mxu0 %vm731_vm1, %v717_v10 }
  0x4b   : > { %2919 = vmatmul.msk.bf16.gmra.mxu0 %vm731_vm1, %v718_v13  ;;  %v951_v13 = vadd.f32 %v3459_v30, %v3117_v7 }
  0x5b   : > { %2920 = vmatmul.msk.bf16.gmra.mxu0 %vm731_vm1, %v719_v16 }
  0x6b   : > { %2921 = vmatmul.msk.bf16.gmra.mxu0 %vm731_vm1, %v720_v19  ;;  %v705_v19 = vld [vmem:[%s3421_s11 + $0xb0] sm:$0xff] }
  0x6c   : > { %v726_v24 = vpack.c.bf16 %v706_v20, %v705_v19  ;;  %v3145_v19 = vld [vmem:[%s3451_s20 + $0x18] sm:$0xff]  }
  0x7b   : > { %2922 = vmatmul.msk.bf16.gmra.mxu0 %vm731_vm1, %v721_v22 }
  0x8b   : > { %2923 = vmatmul.msk.bf16.gmra.mxu0 %vm731_vm1, %v722_v25 }
  0x98   : > { %v793_v32 = vpop.f32.mrf.mxu0 }
  0x99   : > { %v976_v35 = vadd.f32 %v948_v33, %v793_v32 }
  0x9b   : > { %2924 = vmatmul.msk.bf16.gmra.mxu0 %vm731_vm1, %v723_v31  ;;  %v1159_v38 = vpack.c.bf16 %v976_v35, %v976_v35 }
  0x9d   : > { %v1231_v43 = vunpack.c.l.b16 %v1159_v38 }
  0xa0   : > { %v795_v37 = vpop.f32.mrf.mxu0 }
  0xa1   : > { %v977_v39 = vadd.f32 %v949_v36, %v795_v37  ;;  %v3144_v37 = vld [vmem:[%s3451_s20 + $0x10] sm:$0xff]  }
  0xa3   : > { %v1160_v40 = vpack.c.bf16 %v977_v39, %v977_v39  ;;  %v707_v39 = vld [vmem:[%s3421_s11 + $0xc0] sm:$0xff] }
  0xa5   : > { %v1232_v44 = vunpack.c.l.b16 %v1160_v40  ;;  %v708_v40 = vld [vmem:[%s3421_s11 + $0xc8] sm:$0xff] }
  0xa7   : > { %v1266_v45 = vpack.c.b16 %v1232_v44, %v1231_v43  ;;  %v3120_v43 = vunpack.c.l.bf16 %v3144_v37 }
  0xa8   : > { %v798_v47 = vpop.f32.mrf.mxu0 }
  0xa9   : > { %v1291_v48 = vshrl.u32 %v1266_v45, 16  ;;  %v1294_v51 = vshll.u32 %v1266_v45, 16  ;;  %v978_v52 = vadd.f32 %v948_v33, %v798_v47  ;;  %v727_v45 = vpack.c.bf16 %v708_v40, %v707_v39 }
  0xaa   : > { %v952_v47 = vadd.f32 %v3459_v30, %v3120_v43 }
  0xab   : > { %2925 = vmatmul.msk.bf16.gmra.mxu0 %vm731_vm1, %v724_v46  ;;  %v1293_v50 = vrot.slane %v1291_v48, 7  ;;  %v1161_v57 = vpack.c.bf16 %v978_v52, %v978_v52 }
  0xad   : > { %v3473_v53 = vsel %vm3466_vm4, %v1293_v50, 0  ;;  %v1296_v54 = vor.u32 %v1294_v51, %v1293_v50  ;;  %v1233_v63 = vunpack.c.l.b16 %v1161_v57  ;;  %v3121_v50 = vunpack.c.h.bf16 %v3144_v37  ;;  %v3096_v37 = vld [vmem:[%s4159_s8 + $0x28] sm:$0xff] }
  0xae   : > { %1518 = vrot.lane.b32.xlu1 %v3473_v53, %s4162_s26  ;;  %2238 = vmatpush.bf16.msra.mxu1 %v3096_v37 }
  0xaf   : > { %v3479_v55 = vsel %vm3466_vm4, 0, %v1296_v54  ;;  %v953_v57 = vadd.f32 %v3459_v30, %v3121_v50  ;;  %v3107_v50 = vld [vmem:[%s4159_s8 + $0x80] sm:$0xff] }
  0xb0   : > { %1516 = vrot.lane.b32.xlu0 %v3479_v55, %s4162_s26  ;;  %v800_v56 = vpop.f32.mrf.mxu0 }
  0xb1   : > { %v979_v58 = vadd.f32 %v949_v36, %v800_v56 }
  0xb3   : > { %v1162_v60 = vpack.c.bf16 %v979_v58, %v979_v58 }
  0xb5   : > { %v1234_v0 = vunpack.c.l.b16 %v1162_v60 }
  0xb7   : > { %v1267_v2 = vpack.c.b16 %v1234_v0, %v1233_v63  ;;  %v709_v0 = vld [vmem:[%s3421_s11 + $0xd0] sm:$0xff] }
  0xb8   : > { %v803_v4 = vpop.f32.mrf.mxu0 }
  0xb9   : > { %v1298_v6 = vshrl.u32 %v1267_v2, 16  ;;  %v1301_v9 = vshll.u32 %v1267_v2, 16  ;;  %v980_v10 = vadd.f32 %v950_v5, %v803_v4 }
  0xbb   : > { %2926 = vmatmul.msk.bf16.gmra.mxu0 %vm731_vm1, %v725_v3  ;;  %v1300_v8 = vrot.slane %v1298_v6, 7  ;;  %v1163_v16 = vpack.c.bf16 %v980_v10, %v980_v10 }
  0xbd   : > { %v3490_v11 = vsel %vm3466_vm4, %v1300_v8, 0  ;;  %v1303_v12 = vor.u32 %v1301_v9, %v1300_v8  ;;  %v1235_v21 = vunpack.c.l.b16 %v1163_v16 }
  0xbe   : > { %1584 = vrot.lane.b32.xlu1 %v3490_v11, %s3293_s27 }
  0xbf   : > { %v3497_v14 = vsel %vm3466_vm4, 0, %v1303_v12 }
  0xc0   : > { %1520 = vrot.lane.b32.xlu2 %v3497_v14, %s4162_s26  ;;  %1582 = vrot.lane.b32.xlu0 %v3497_v14, %s3293_s27  ;;  %v805_v15 = vpop.f32.mrf.mxu0 }
  0xc1   : > { %v981_v17 = vadd.f32 %v951_v13, %v805_v15 }
  0xc3   : > { %v1164_v18 = vpack.c.bf16 %v981_v17, %v981_v17 }
  0xc5   : > { %v1236_v22 = vunpack.c.l.b16 %v1164_v18 }
  0xc7   : > { %v1268_v23 = vpack.c.b16 %v1236_v22, %v1235_v21  ;;  %v711_v21 = vld [vmem:[%s3421_s11 + $0xe0] sm:$0xff]  ;;  %v712_v22 = vld [vmem:[%s3421_s11 + $0xe8] sm:$0xff] }
  0xc8   : > { %1522 = vrot.lane.b32.xlu0 %v3490_v11, %s4162_s26  ;;  %v808_v25 = vpop.f32.mrf.mxu0 }
  0xc9   : > { %v1305_v26 = vshrl.u32 %v1268_v23, 16  ;;  %v1308_v28 = vshll.u32 %v1268_v23, 16  ;;  %v982_v29 = vadd.f32 %v950_v5, %v808_v25  ;;  %v728_v5 = vpack.c.bf16 %v710_v1, %v709_v0  ;;  %v3101_v0 = vld [vmem:[%s4159_s8 + $0x50] sm:$0xff]  ;;  %v3106_v1 = vld [vmem:[%s4159_s8 + $0x78] sm:$0xff] }
  0xca   : > { %v3124_v25 = vunpack.c.l.bf16 %v3145_v19 }
  0xcb   : > { %2927 = vmatmul.msk.bf16.gmra.mxu0 %vm731_vm1, %v726_v24  ;;  %v1307_v27 = vrot.slane %v1305_v26, 7  ;;  %v1165_v35 = vpack.c.bf16 %v982_v29, %v982_v29 }
  0xcc   : > { %v954_v29 = vadd.f32 %v3459_v30, %v3124_v25 }
  0xcd   : > { %v3510_v31 = vsel %vm3466_vm4, %v1307_v27, 0  ;;  %v1310_v32 = vor.u32 %v1308_v28, %v1307_v27  ;;  %v1237_v41 = vunpack.c.l.b16 %v1165_v35  ;;  %v729_v27 = vpack.c.bf16 %v712_v22, %v711_v21  ;;  %v3091_v22 = vld [vmem:[%s4159_s8] sm:$0xff] }
  0xce   : > { %1588 = vrot.lane.b32.xlu1 %v3510_v31, %s3293_s27 }
  0xcf   : > { %v3516_v33 = vsel %vm3466_vm4, 0, %v1310_v32 }
  0xd0   : > { %1586 = vrot.lane.b32.xlu2 %v3516_v33, %s3293_s27  ;;  %v810_v34 = vpop.f32.mrf.mxu0 }
  0xd1   : > { %v983_v36 = vadd.f32 %v951_v13, %v810_v34  ;;  %v3125_v34 = vunpack.c.h.bf16 %v3145_v19  ;;  %v3104_v19 = vld [vmem:[%s4159_s8 + $0x68] sm:$0xff] }
  0xd3   : > { %v1166_v38 = vpack.c.bf16 %v983_v36, %v983_v36  ;;  %v955_v40 = vadd.f32 %v3459_v30, %v3125_v34 }
  0xd5   : > { %v1238_v42 = vunpack.c.l.b16 %v1166_v38 }
  0xd6   : > { %1526 = vrot.lane.b32.xlu1 %v3510_v31, %s4162_s26 }
  0xd7   : > { %v1269_v44 = vpack.c.b16 %v1238_v42, %v1237_v41  ;;  %v3108_v41 = vld [vmem:[%s4159_s8 + $0x88] sm:$0xff] }
  0xd8   : > { %1524 = vrot.lane.b32.xlu2 %v3516_v33, %s4162_s26  ;;  %v813_v46 = vpop.f32.mrf.mxu0  ;;  %2505 = vmatpush.bf16.msrb.mxu2 %v3108_v41 }
  0xd9   : > { %v1312_v48 = vshrl.u32 %v1269_v44, 16  ;;  %v1315_v52 = vshll.u32 %v1269_v44, 16  ;;  %v984_v54 = vadd.f32 %v952_v47, %v813_v46  ;;  %v3095_v44 = vld [vmem:[%s4159_s8 + $0x20] sm:$0xff] }
  0xda   : > { %2239 = vmatpush.bf16.msra.mxu1 %v3095_v44 }
  0xdb   : > { %2928 = vmatmul.msk.bf16.gmra.mxu0 %vm731_vm1, %v727_v45  ;;  %v1314_v51 = vrot.slane %v1312_v48, 7  ;;  %v1167_v61 = vpack.c.bf16 %v984_v54, %v984_v54  ;;  %v3102_v48 = vld [vmem:[%s4159_s8 + $0x58] sm:$0xff]  ;;  %v894_v54 = vld [vmem:[%s628_s17 + $0x8] sm:$0xff] }
  0xdc   : > { %2081 = vmatpush.bf16.msra.mxu3 %v3102_v48  ;;  %2506 = vmatpush.bf16.msrb.mxu2 %v3107_v50 }
  0xdd   : > { %v1317_v56 = vor.u32 %v1315_v52, %v1314_v51  ;;  %v3532_v58 = vsel %vm3466_vm4, %v1314_v51, 0  ;;  %v1239_v2 = vunpack.c.l.b16 %v1167_v61  ;;  %v893_v51 = vld [vmem:[%s628_s17] sm:$0xff] }
  0xde   : > { %v895_v61 = vpack.c.bf16 %v894_v54, %v893_v51 }
  0xdf   : > { %v3536_v59 = vsel %vm3466_vm4, 0, %v1317_v56  ;;  %v3094_v56 = vld [vmem:[%s4159_s8 + $0x18] sm:$0xff] }
  0xe0   : > { %1592 = vrot.lane.b32.xlu2 %v3532_v58, %s3293_s27  ;;  %1590 = vrot.lane.b32.xlu0 %v3536_v59, %s3293_s27  ;;  %v815_v60 = vpop.f32.mrf.mxu0 }
  0xe1   : > { %v985_v62 = vadd.f32 %v953_v57, %v815_v60  ;;  %v714_v60 = vld [vmem:[%s3421_s11 + $0xf8] sm:$0xff]  ;;  %2240 = vmatpush.bf16.msra.mxu1 %v3094_v56  ;;  %2933 = vmatmul.msk.bf16.vlgmr.msra.gmra.mxu2 %vm731_vm1, %v895_v61 }
  0xe2   : > { %2082 = vmatpush.bf16.msra.mxu3 %v3101_v0  ;;  %2507 = vmatpush.bf16.msrb.mxu2 %v3106_v1 }
  0xe3   : > { %v1168_v63 = vpack.c.bf16 %v985_v62, %v985_v62 }
  0xe5   : > { %v1240_v3 = vunpack.c.l.b16 %v1168_v63 }
  0xe7   : > { %v1270_v4 = vpack.c.b16 %v1240_v3, %v1239_v2 }
  0xe8   : > { %1530 = vrot.lane.b32.xlu2 %v3532_v58, %s4162_s26  ;;  %1528 = vrot.lane.b32.xlu0 %v3536_v59, %s4162_s26  ;;  %v818_v6 = vpop.f32.mrf.mxu0 }
  0xe9   : > { %v1319_v7 = vshrl.u32 %v1270_v4, 16  ;;  %v1322_v9 = vshll.u32 %v1270_v4, 16  ;;  %v986_v10 = vadd.f32 %v952_v47, %v818_v6  ;;  %v3093_v4 = vld [vmem:[%s4159_s8 + $0x10] sm:$0xff] }
  0xea   : > { %2241 = vmatpush.bf16.msra.mxu1 %v3093_v4 }
  0xeb   : > { %2929 = vmatmul.msk.bf16.gmra.mxu0 %vm731_vm1, %v728_v5  ;;  %v1321_v8 = vrot.slane %v1319_v7, 7  ;;  %v1169_v17 = vpack.c.bf16 %v986_v10, %v986_v10  ;;  %v3100_v7 = vld [vmem:[%s4159_s8 + $0x48] sm:$0xff] }
  0xec   : > { %2083 = vmatpush.bf16.msra.mxu3 %v3100_v7 }
  0xed   : > { %v1324_v12 = vor.u32 %v1322_v9, %v1321_v8  ;;  %v3551_v13 = vsel %vm3466_vm4, %v1321_v8, 0  ;;  %v1241_v23 = vunpack.c.l.b16 %v1169_v17  ;;  %v3105_v8 = vld [vmem:[%s4159_s8 + $0x70] sm:$0xff] }
  0xee   : > { %2508 = vmatpush.bf16.msrb.mxu2 %v3105_v8 }
  0xef   : > { %v3555_v15 = vsel %vm3466_vm4, 0, %v1324_v12  ;;  %v3092_v12 = vld [vmem:[%s4159_s8 + $0x8] sm:$0xff] }
  0xf0   : > { %1596 = vrot.lane.b32.xlu0 %v3551_v13, %s3293_s27  ;;  %1594 = vrot.lane.b32.xlu1 %v3555_v15, %s3293_s27  ;;  %v820_v16 = vpop.f32.mrf.mxu0 }
  0xf1   : > { %v987_v18 = vadd.f32 %v953_v57, %v820_v16  ;;  %v713_v57 = vld [vmem:[%s3421_s11 + $0xf0] sm:$0xff]  ;;  %2242 = vmatpush.bf16.msra.mxu1 %v3092_v12 }
  0xf2   : > { %v730_v3 = vpack.c.bf16 %v714_v60, %v713_v57  ;;  %2509 = vmatpush.bf16.msrb.mxu2 %v3104_v19 }
  0xf3   : > { %v1170_v20 = vpack.c.bf16 %v987_v18, %v987_v18  ;;  %v3099_v18 = vld [vmem:[%s4159_s8 + $0x40] sm:$0xff] }
  0xf4   : > { %2084 = vmatpush.bf16.msra.mxu3 %v3099_v18 }
  0xf5   : > { %v1242_v24 = vunpack.c.l.b16 %v1170_v20  ;;  %2243 = vmatpush.bf16.msra.mxu1 %v3091_v22 }
  0xf7   : > { %v1271_v26 = vpack.c.b16 %v1242_v24, %v1241_v23 }
  0xf8   : > { %1534 = vrot.lane.b32.xlu0 %v3551_v13, %s4162_s26  ;;  %1532 = vrot.lane.b32.xlu1 %v3555_v15, %s4162_s26  ;;  %v823_v28 = vpop.f32.mrf.mxu0 }
  0xf9   : > { %v1326_v32 = vshrl.u32 %v1271_v26, 16  ;;  %v1329_v35 = vshll.u32 %v1271_v26, 16  ;;  %v988_v38 = vadd.f32 %v954_v29, %v823_v28  ;;  %v3146_v26 = vld [vmem:[%s3451_s20 + $0x20] sm:$0xff]  }
  0xfa   : > { %v3103_v28 = vld [vmem:[%s4159_s8 + $0x60] sm:$0xff]  ;;  %v3129_v41 = vunpack.c.h.bf16 %v3146_v26 }
  0xfb   : > { %2930 = vmatmul.msk.bf16.gmra.mxu0 %vm731_vm1, %v729_v27  ;;  %v1328_v36 = vrot.slane %v1326_v32, 7  ;;  %v1171_v46 = vpack.c.bf16 %v988_v38, %v988_v38  ;;  %v3098_v27 = vld [vmem:[%s4159_s8 + $0x38] sm:$0xff]  ;;  %2510 = vmatpush.bf16.msrb.mxu2 %v3103_v28 }
  0xfc   : > { %2085 = vmatpush.bf16.msra.mxu3 %v3098_v27  ;;  %v957_v51 = vadd.f32 %v3459_v30, %v3129_v41 }
  0xfd   : > { %v1331_v39 = vor.u32 %v1329_v35, %v1328_v36  ;;  %v3580_v42 = vsel %vm3466_vm4, %v1328_v36, 0  ;;  %v1243_v62 = vunpack.c.l.b16 %v1171_v46  ;;  %v3128_v35 = vunpack.c.l.bf16 %v3146_v26  ;;  %v3097_v36 = vld [vmem:[%s4159_s8 + $0x30] sm:$0xff] }
  0xff   : > { %v3584_v43 = vsel %vm3466_vm4, 0, %v1331_v39  ;;  %v956_v39 = vadd.f32 %v3459_v30, %v3128_v35 }
 0x100   : > { %1600 = vrot.lane.b32.xlu1 %v3580_v42, %s3293_s27  ;;  %1598 = vrot.lane.b32.xlu2 %v3584_v43, %s3293_s27  ;;  %v825_v45 = vpop.f32.mrf.mxu0 }
 0x101   : > { %v989_v47 = vadd.f32 %v955_v40, %v825_v45  ;;  %2086 = vmatpush.bf16.msra.mxu3 %v3097_v36  ;;  %v3294_v45 = vmov 0.0|0.0   ;;  %v3147_v36 = vld [vmem:[%s3451_s20 + $0x28] sm:$0xff]  }
 0x102   : > { %v1229_v46 = vunpack.c.l.b16 %v3294_v45 }
 0x103   : > { %v1172_v52 = vpack.c.bf16 %v989_v47, %v989_v47 }
 0x105   : > { %v1244_v63 = vunpack.c.l.b16 %v1172_v52  ;;  %v1265_v52 = vpack.c.b16 %v1229_v46, %v1229_v46 }
 0x107   : > { %v1272_v2 = vpack.c.b16 %v1244_v63, %v1243_v62  ;;  %v1284_v62 = vshrl.u32 %v1265_v52, 16  ;;  %v1287_v4 = vshll.u32 %v1265_v52, 16 }
 0x108   : > { %1538 = vrot.lane.b32.xlu1 %v3580_v42, %s4168_s25  ;;  %1536 = vrot.lane.b32.xlu2 %v3584_v43, %s4168_s25  ;;  %v828_v5 = vpop.f32.mrf.mxu0 }
 0x109   : > { %v1333_v6 = vshrl.u32 %v1272_v2, 16  ;;  %v1336_v9 = vshll.u32 %v1272_v2, 16  ;;  %v990_v16 = vadd.f32 %v954_v29, %v828_v5  ;;  %v1286_v2 = vrot.slane %v1284_v62, 7 }
 0x10b   : > { %2931 = vmatmul.msk.bf16.gmra.mxu0 %vm731_vm1, %v730_v3  ;;  %v1335_v10 = vrot.slane %v1333_v6, 7  ;;  %v1173_v24 = vpack.c.bf16 %v990_v16, %v990_v16  ;;  %v3686_v16 = vsel %vm3466_vm4, %v1286_v2, 0 }
 0x10d   : > { %v1338_v17 = vor.u32 %v1336_v9, %v1335_v10  ;;  %v3639_v20 = vsel %vm3466_vm4, %v1335_v10, 0  ;;  %v1245_v32 = vunpack.c.l.b16 %v1173_v24  ;;  %v1289_v10 = vor.u32 %v1287_v4, %v1286_v2 }
 0x10f   : > { %v3643_v21 = vsel %vm3466_vm4, 0, %v1338_v17  ;;  %v3690_v19 = vsel %vm3466_vm4, 0, %v1289_v10 }
 0x110   : > { %1604 = vrot.lane.b32.xlu2 %v3639_v20, %s3293_s27  ;;  %1602 = vrot.lane.b32.xlu0 %v3643_v21, %s3293_s27  ;;  %v830_v23 = vpop.f32.mrf.mxu0 }
 0x111   : > { %v991_v25 = vadd.f32 %v955_v40, %v830_v23 }
 0x113   : > { %v1174_v29 = vpack.c.bf16 %v991_v25, %v991_v25 }
 0x115   : > { %v1246_v34 = vunpack.c.l.b16 %v1174_v29 }
 0x117   : > { %v1273_v37 = vpack.c.b16 %v1246_v34, %v1245_v32 }
 0x118   : > { %1542 = vrot.lane.b32.xlu2 %v3639_v20, %s4168_s25  ;;  %1540 = vrot.lane.b32.xlu0 %v3643_v21, %s4168_s25  ;;  %v833_v38 = vpop.f32.mrf.mxu0 }
 0x119   : > { %v1340_v40 = vshrl.u32 %v1273_v37, 16  ;;  %v1343_v44 = vshll.u32 %v1273_v37, 16  ;;  %v992_v48 = vadd.f32 %v956_v39, %v833_v38 }
 0x11a   : > { %v1521_v32 = vpop.permute.xlu2 %1520 }
 0x11b   : > { %v1342_v47 = vrot.slane %v1340_v40, 7  ;;  %v1175_v60 = vpack.c.bf16 %v992_v48, %v992_v48 }
 0x11d   : > { %v1345_v50 = vor.u32 %v1343_v44, %v1342_v47  ;;  %v3670_v54 = vsel %vm3466_vm4, %v1342_v47, 0  ;;  %v1247_v0 = vunpack.c.l.b16 %v1175_v60  ;;  %v3132_v47 = vunpack.c.l.bf16 %v3147_v36 }
 0x11f   : > { %v3674_v56 = vsel %vm3466_vm4, 0, %v1345_v50  ;;  %v958_v62 = vadd.f32 %v3459_v30, %v3132_v47 }
 0x120   : > { %1608 = vrot.lane.b32.xlu0 %v3670_v54, %s3293_s27  ;;  %1606 = vrot.lane.b32.xlu1 %v3674_v56, %s3293_s27  ;;  %v835_v57 = vpop.f32.mrf.mxu0  ;;  %v1519_v5 = vpop.permute.xlu1 %1518 }
 0x121   : > { %v993_v61 = vadd.f32 %v957_v51, %v835_v57  ;;  %v1652_v24 = vsel %vm1646_vm5, %v3686_v16, %v1519_v5  ;;  %v1655_v5 = vsel %vm1646_vm5, %v3479_v55, %v1521_v32 }
 0x122   : > { %v1517_v8 = vpop.permute.xlu0 %1516 }
 0x123   : > { %v1176_v63 = vpack.c.bf16 %v993_v61, %v993_v61  ;;  %v1649_v34 = vsel %vm1646_vm5, %v3690_v19, %v1517_v8 }
 0x125   : > { %v1248_v1 = vunpack.c.l.b16 %v1176_v63 }
 0x127   : > { %v1274_v3 = vpack.c.b16 %v1248_v1, %v1247_v0  ;;  %v3133_v0 = vunpack.c.h.bf16 %v3147_v36 }
 0x128   : > { %1546 = vrot.lane.b32.xlu0 %v3670_v54, %s4168_s25  ;;  %1544 = vrot.lane.b32.xlu1 %v3674_v56, %s4168_s25  ;;  %v838_v6 = vpop.f32.mrf.mxu0 }
 0x129   : > { %v1347_v7 = vshrl.u32 %v1274_v3, 16  ;;  %v1350_v9 = vshll.u32 %v1274_v3, 16  ;;  %v994_v17 = vadd.f32 %v956_v39, %v838_v6  ;;  %v959_v10 = vadd.f32 %v3459_v30, %v3133_v0 }
 0x12a   : > { %v1587_v1 = vpop.permute.xlu2 %1586 }
 0x12b   : > { %v1349_v12 = vrot.slane %v1347_v7, 7  ;;  %v1177_v27 = vpack.c.bf16 %v994_v17, %v994_v17  ;;  %v1749_v6 = vsel %vm1743_vm6, %v1655_v5, %v1587_v1 }
 0x12c   : > { %v2361_v36 = vrot.slane %v1749_v6, 1 }
 0x12d   : > { %v1352_v18 = vor.u32 %v1350_v9, %v1349_v12  ;;  %v3694_v22 = vsel %vm3466_vm4, %v1349_v12, 0  ;;  %v1249_v45 = vunpack.c.l.b16 %v1177_v27 }
 0x12f   : > { %v3698_v23 = vsel %vm3466_vm4, 0, %v1352_v18  ;;  %v1833_v18 = vshll.u32 %v1749_v6, 16 }
 0x130   : > { %v1585_v25 = vpop.permute.xlu1 %1584  ;;  %1612 = vrot.lane.b32.xlu1 %v3694_v22, %s3293_s27  ;;  %1610 = vrot.lane.b32.xlu2 %v3698_v23, %s3293_s27  ;;  %v840_v26 = vpop.f32.mrf.mxu0 }
 0x131   : > { %v1747_v28 = vsel %vm1743_vm6, %v1652_v24, %v1585_v25  ;;  %v995_v29 = vadd.f32 %v957_v51, %v840_v26 }
 0x132   : > { %v1583_v35 = vpop.permute.xlu0 %1582  ;;  %v1827_v39 = vshll.u32 %v1747_v28, 16  ;;  %v2359_v40 = vrot.slane %v1747_v28, 1 }
 0x133   : > { %v1178_v37 = vpack.c.bf16 %v995_v29, %v995_v29  ;;  %v1745_v38 = vsel %vm1743_vm6, %v1649_v34, %v1583_v35  ;;  %v1835_v35 = vrot.slane %v1833_v18, 1 }
 0x134   : > { %v1823_v41 = vshll.u32 %v1745_v38, 16  ;;  %v2358_v44 = vrot.slane %v1745_v38, 1  ;;  %3010 = vmatmul.msk.bf16.vlgmr.msra.gmra.mxu1 %vm2030_vm7, %v1745_v38  ;;  %v1821_v48 = vshrl.u32 %v1745_v38, 16  ;;  %v1829_v57 = vrot.slane %v1827_v39, 1  ;;  %v1525_v39 = vpop.permute.xlu2 %1524 }
 0x135   : > { %v1250_v46 = vunpack.c.l.b16 %v1178_v37  ;;  %v1831_v38 = vshrl.u32 %v1749_v6, 16 }
 0x136   : > { %v1825_v50 = vrot.slane %v1823_v41, 1  ;;  %v2360_v51 = vsel %vm2357_vm8, %v2358_v44, %v2359_v40 }
 0x137   : > { %v1275_v52 = vpack.c.b16 %v1250_v46, %v1249_v45  ;;  %3062 = vmatmul.msk.bf16.vlgmr.msrb.gmra.mxu2 %vm2030_vm7, %v2360_v51  ;;  %v1836_v46 = vor.u32 %v1835_v35, %v1831_v38 }
 0x138   : > { %1550 = vrot.lane.b32.xlu1 %v3694_v22, %s4168_s25  ;;  %1548 = vrot.lane.b32.xlu2 %v3698_v23, %s4168_s25  ;;  %v843_v60 = vpop.f32.mrf.mxu0  ;;  %v1826_v61 = vor.u32 %v1825_v50, %v1821_v48 }
 0x139   : > { %v1354_v63 = vshrl.u32 %v1275_v52, 16  ;;  %v1357_v3 = vshll.u32 %v1275_v52, 16  ;;  %v996_v7 = vadd.f32 %v958_v62, %v843_v60 }
 0x13a   : > { %v1830_v2 = vsel %vm1820_vm9, %v1826_v61, %v1829_v57  ;;  %v1523_v8 = vpop.permute.xlu0 %1522 }
 0x13b   : > { %2970 = vmatmul.msk.bf16.vlgmr.msra.gmra.mxu3 %vm2030_vm7, %v1830_v2  ;;  %v1356_v4 = vrot.slane %v1354_v63, 7  ;;  %v1658_v24 = vsel %vm1646_vm5, %v3473_v53, %v1523_v8  ;;  %v1179_v26 = vpack.c.bf16 %v996_v7, %v996_v7 }
 0x13c   : > { %v1593_v1 = vpop.permute.xlu2 %1592 }
 0x13d   : > { %v1359_v9 = vor.u32 %v1357_v3, %v1356_v4  ;;  %v3727_v12 = vsel %vm3466_vm4, %v1356_v4, 0  ;;  %v1251_v53 = vunpack.c.l.b16 %v1179_v26  ;;  %v1661_v4 = vsel %vm1646_vm5, %v3497_v14, %v1525_v39 }
 0x13f   : > { %v3731_v17 = vsel %vm3466_vm4, 0, %v1359_v9 }
 0x140   : > { %v1589_v55 = vpop.permute.xlu1 %1588  ;;  %1616 = vrot.lane.b32.xlu2 %v3727_v12, %s3293_s27  ;;  %1614 = vrot.lane.b32.xlu0 %v3731_v17, %s3293_s27  ;;  %v845_v25 = vpop.f32.mrf.mxu0 }
 0x141   : > { %v1751_v27 = vsel %vm1743_vm6, %v1658_v24, %v1589_v55  ;;  %v997_v28 = vadd.f32 %v959_v10, %v845_v25 }
 0x142   : > { %v1837_v29 = vshll.u32 %v1751_v27, 16  ;;  %v2362_v32 = vrot.slane %v1751_v27, 1 }
 0x143   : > { %v1180_v34 = vpack.c.bf16 %v997_v28, %v997_v28 }
 0x144   : > { %3011 = vmatmul.msk.bf16.gmra.mxu1 %vm2030_vm7, %v1749_v6  ;;  %v1839_v40 = vrot.slane %v1837_v29, 1  ;;  %v2363_v41 = vsel %vm2357_vm8, %v2361_v36, %v2362_v32  ;;  %v3148_v6 = vld [vmem:[%s3451_s20 + $0x30] sm:$0xff]  }
 0x145   : > { %v1252_v37 = vunpack.c.l.b16 %v1180_v34  ;;  %v3136_v27 = vunpack.c.l.bf16 %v3148_v6 }
 0x146   : > { %v1840_v48 = vsel %vm1820_vm9, %v1836_v46, %v1839_v40 }
 0x147   : > { %v1276_v44 = vpack.c.b16 %v1252_v37, %v1251_v53  ;;  %3063 = vmatmul.msk.bf16.gmra.mxu2 %vm2030_vm7, %v2363_v41  ;;  %v960_v36 = vadd.f32 %v3459_v30, %v3136_v27  ;;  %v3137_v37 = vunpack.c.h.bf16 %v3148_v6 }
 0x148   : > { %1554 = vrot.lane.b32.xlu2 %v3727_v12, %s4168_s25  ;;  %1552 = vrot.lane.b32.xlu0 %v3731_v17, %s4168_s25  ;;  %v848_v45 = vpop.f32.mrf.mxu0  ;;  %v1527_v51 = vpop.permute.xlu1 %1526 }
 0x149   : > { %v1361_v47 = vshrl.u32 %v1276_v44, 16  ;;  %v1364_v50 = vshll.u32 %v1276_v44, 16  ;;  %v998_v57 = vadd.f32 %v958_v62, %v848_v45  ;;  %v1664_v61 = vsel %vm1646_vm5, %v3490_v11, %v1527_v51 }
 0x14a   : > { %v1755_v2 = vsel %vm1743_vm6, %v1664_v61, %v1593_v1  ;;  %v961_v46 = vadd.f32 %v3459_v30, %v3137_v37 }
 0x14b   : > { %2971 = vmatmul.msk.bf16.gmra.mxu3 %vm2030_vm7, %v1840_v48  ;;  %v1363_v52 = vrot.slane %v1361_v47, 7  ;;  %v1181_v3 = vpack.c.bf16 %v998_v57, %v998_v57  ;;  %v1847_v9 = vshll.u32 %v1755_v2, 16  ;;  %v2365_v18 = vrot.slane %v1755_v2, 1  ;;  %v1531_v47 = vpop.permute.xlu2 %1530 }
 0x14d   : > { %v1366_v60 = vor.u32 %v1364_v50, %v1363_v52  ;;  %v3753_v63 = vsel %vm3466_vm4, %v1363_v52, 0  ;;  %v1253_v25 = vunpack.c.l.b16 %v1181_v3  ;;  %v1849_v14 = vrot.slane %v1847_v9, 1 }
 0x14f   : > { %v3757_v0 = vsel %vm3466_vm4, 0, %v1366_v60  ;;  %v1670_v60 = vsel %vm1646_vm5, %v3510_v31, %v1531_v47 }
 0x150   : > { %1620 = vrot.lane.b32.xlu0 %v3753_v63, %s3293_s27  ;;  %1618 = vrot.lane.b32.xlu1 %v3757_v0, %s3293_s27  ;;  %v850_v62 = vpop.f32.mrf.mxu0 }
 0x151   : > { %v999_v11 = vadd.f32 %v959_v10, %v850_v62 }
 0x152   : > { %v1591_v5 = vpop.permute.xlu0 %1590 }
 0x153   : > { %v1182_v7 = vpack.c.bf16 %v999_v11, %v999_v11  ;;  %v1753_v8 = vsel %vm1743_vm6, %v1661_v4, %v1591_v5 }
 0x154   : > { %v1843_v24 = vshll.u32 %v1753_v8, 16  ;;  %v2364_v55 = vrot.slane %v1753_v8, 1  ;;  %3012 = vmatmul.msk.bf16.gmra.mxu1 %vm2030_vm7, %v1753_v8  ;;  %v1841_v28 = vshrl.u32 %v1753_v8, 16 }
 0x155   : > { %v1254_v26 = vunpack.c.l.b16 %v1182_v7 }
 0x156   : > { %v1845_v29 = vrot.slane %v1843_v24, 1  ;;  %v2366_v10 = vsel %vm2357_vm8, %v2364_v55, %v2365_v18 }
 0x157   : > { %v1277_v32 = vpack.c.b16 %v1254_v26, %v1253_v25  ;;  %3064 = vmatmul.msk.bf16.gmra.mxu2 %vm2030_vm7, %v2366_v10 }
 0x158   : > { %1558 = vrot.lane.b32.xlu0 %v3753_v63, %s4168_s25  ;;  %1556 = vrot.lane.b32.xlu1 %v3757_v0, %s4168_s25  ;;  %v853_v34 = vpop.f32.mrf.mxu0  ;;  %v1846_v35 = vor.u32 %v1845_v29, %v1841_v28 }
 0x159   : > { %v1368_v53 = vshrl.u32 %v1277_v32, 16  ;;  %v1371_v40 = vshll.u32 %v1277_v32, 16  ;;  %v1000_v44 = vadd.f32 %v960_v36, %v853_v34 }
 0x15a   : > { %v1529_v38 = vpop.permute.xlu0 %1528  ;;  %v1850_v39 = vsel %vm1820_vm9, %v1846_v35, %v1849_v14  ;;  %v1599_v34 = vpop.permute.xlu2 %1598 }
 0x15b   : > { %2972 = vmatmul.msk.bf16.gmra.mxu3 %vm2030_vm7, %v1850_v39  ;;  %v1370_v41 = vrot.slane %v1368_v53, 7  ;;  %v1183_v52 = vpack.c.bf16 %v1000_v44, %v1000_v44  ;;  %v1667_v61 = vsel %vm1646_vm5, %v3516_v33, %v1529_v38 }
 0x15d   : > { %v1373_v45 = vor.u32 %v1371_v40, %v1370_v41  ;;  %v3781_v48 = vsel %vm3466_vm4, %v1370_v41, 0  ;;  %v1255_v7 = vunpack.c.l.b16 %v1183_v52 }
 0x15f   : > { %v3785_v50 = vsel %vm3466_vm4, 0, %v1373_v45 }
 0x160   : > { %1624 = vrot.lane.b32.xlu1 %v3781_v48, %s3293_s27  ;;  %1622 = vrot.lane.b32.xlu2 %v3785_v50, %s3293_s27  ;;  %v855_v51 = vpop.f32.mrf.mxu0 }
 0x161   : > { %v1001_v57 = vadd.f32 %v961_v46, %v855_v51  ;;  %v3149_v51 = vld [vmem:[%s3451_s20 + $0x38] sm:$0xff]   ;;  %s585_s20 = sand.u32 1, %s3274_s5  }
 0x162   : > { %v1597_v1 = vpop.permute.xlu0 %1596  ;;  %v1595_v62 = vpop.permute.xlu1 %1594  ;;  %s2693_s14 = scalar_lea.sflag [#allocation3], %s585_s20 }
 0x163   : > { %v1184_v2 = vpack.c.bf16 %v1001_v57, %v1001_v57  ;;  %v1759_v3 = vsel %vm1743_vm6, %v1670_v60, %v1597_v1  ;;  %v1757_v11 = vsel %vm1743_vm6, %v1667_v61, %v1595_v62 }
 0x164   : > { %v1857_v4 = vshll.u32 %v1759_v3, 16  ;;  %v2368_v5 = vrot.slane %v1759_v3, 1  ;;  %v1853_v6 = vshll.u32 %v1757_v11, 16  ;;  %3013 = vmatmul.msk.bf16.gmra.mxu1 %vm2030_vm7, %v1757_v11  ;;  %v2367_v9 = vrot.slane %v1757_v11, 1 }
 0x165   : > { %v1256_v8 = vunpack.c.l.b16 %v1184_v2  ;;  %v1851_v18 = vshrl.u32 %v1757_v11, 16  ;;  %v3140_v11 = vunpack.c.l.bf16 %v3149_v51 }
 0x166   : > { %v1855_v31 = vrot.slane %v1853_v6, 1  ;;  %v2369_v33 = vsel %vm2357_vm8, %v2367_v9, %v2368_v5  ;;  %v1859_v55 = vrot.slane %v1857_v4, 1  ;;  %v1537_v4 = vpop.permute.xlu2 %1536 }
 0x167   : > { %v1278_v24 = vpack.c.b16 %v1256_v8, %v1255_v7  ;;  %3065 = vmatmul.msk.bf16.gmra.mxu2 %vm2030_vm7, %v2369_v33  ;;  %v962_v9 = vadd.f32 %v3459_v30, %v3140_v11 }
 0x168   : > { %1562 = vrot.lane.b32.xlu1 %v3781_v48, %s4168_s25  ;;  %v858_v25 = vpop.f32.mrf.mxu0  ;;  %v1856_v26 = vor.u32 %v1855_v31, %v1851_v18  ;;  %1560 = vrot.lane.b32.xlu2 %v3785_v50, %s4168_s25  ;;  %v3141_v31 = vunpack.c.h.bf16 %v3149_v51 }
 0x169   : > { %v1375_v27 = vshrl.u32 %v1278_v24, 16  ;;  %v1378_v10 = vshll.u32 %v1278_v24, 16  ;;  %v1002_v35 = vadd.f32 %v960_v36, %v858_v25 }
 0x16a   : > { %v1533_v28 = vpop.permute.xlu1 %1532  ;;  %v1860_v29 = vsel %vm1820_vm9, %v1856_v26, %v1859_v55  ;;  %v1535_v38 = vpop.permute.xlu0 %1534 }
 0x16b   : > { %v1673_v32 = vsel %vm1646_vm5, %v3536_v59, %v1533_v28  ;;  %2973 = vmatmul.msk.bf16.gmra.mxu3 %vm2030_vm7, %v1860_v29  ;;  %v1377_v14 = vrot.slane %v1375_v27, 7  ;;  %v1185_v44 = vpack.c.bf16 %v1002_v35, %v1002_v35  ;;  %v1676_v45 = vsel %vm1646_vm5, %v3532_v58, %v1535_v38 }
 0x16c   : > { %v1761_v37 = vsel %vm1743_vm6, %v1673_v32, %v1599_v34  ;;  %v963_v27 = vadd.f32 %v3459_v30, %v3141_v31 }
 0x16d   : > { %v1380_v53 = vor.u32 %v1378_v10, %v1377_v14  ;;  %v3815_v40 = vsel %vm3466_vm4, %v1377_v14, 0  ;;  %v1863_v41 = vshll.u32 %v1761_v37, 16  ;;  %v2370_v62 = vrot.slane %v1761_v37, 1 }
 0x16e   : > { %v1257_v2 = vunpack.c.l.b16 %v1185_v44  ;;  %v1605_v32 = vpop.permute.xlu2 %1604 }
 0x16f   : > { %v3811_v39 = vsel %vm3466_vm4, 0, %v1380_v53  ;;  %v1865_v1 = vrot.slane %v1863_v41, 1  ;;  %v1679_v53 = vsel %vm1646_vm5, %v3555_v15, %v1537_v4 }
 0x170   : > { %1626 = vrot.lane.b32.xlu0 %v3811_v39, %s3293_s27  ;;  %v860_v59 = vpop.f32.mrf.mxu0  ;;  %1628 = vrot.lane.b32.xlu2 %v3815_v40, %s3293_s27 }
 0x171   : > { %v1003_v36 = vadd.f32 %v961_v46, %v860_v59  ;;  %v1861_v46 = vshrl.u32 %v1761_v37, 16 }
 0x172   : > { %v1601_v47 = vpop.permute.xlu1 %1600 }
 0x173   : > { %v1186_v52 = vpack.c.bf16 %v1003_v36, %v1003_v36  ;;  %v1763_v57 = vsel %vm1743_vm6, %v1676_v45, %v1601_v47  ;;  %v1866_v8 = vor.u32 %v1865_v1, %v1861_v46 }
 0x174   : > { %v1867_v60 = vshll.u32 %v1763_v57, 16  ;;  %v2371_v61 = vrot.slane %v1763_v57, 1  ;;  %3014 = vmatmul.msk.bf16.gmra.mxu1 %vm2030_vm7, %v1761_v37 }
 0x175   : > { %v1258_v3 = vunpack.c.l.b16 %v1186_v52 }
 0x176   : > { %v1869_v5 = vrot.slane %v1867_v60, 1  ;;  %v2372_v6 = vsel %vm2357_vm8, %v2370_v62, %v2371_v61 }
 0x177   : > { %v1279_v58 = vpack.c.b16 %v1258_v3, %v1257_v2  ;;  %3066 = vmatmul.msk.bf16.gmra.mxu2 %vm2030_vm7, %v2372_v6  ;;  %v908_v3 = vpop.f32.mrf.mxu2 }
 0x178   : > { %1564 = vrot.lane.b32.xlu0 %v3811_v39, %s4168_s25  ;;  %v863_v7 = vpop.f32.mrf.mxu0  ;;  %1566 = vrot.lane.b32.xlu2 %v3815_v40, %s4168_s25  ;;  %v1870_v24 = vsel %vm1820_vm9, %v1866_v8, %v1869_v5 }
 0x179   : > { %v1382_v18 = vshrl.u32 %v1279_v58, 16  ;;  %v1385_v25 = vshll.u32 %v1279_v58, 16  ;;  %v1004_v26 = vadd.f32 %v962_v9, %v863_v7  ;;  %v1543_v7 = vpop.permute.xlu2 %1542 }
 0x17a   : > { %v1539_v33 = vpop.permute.xlu1 %1538 }
 0x17b   : > { %2974 = vmatmul.msk.bf16.gmra.mxu3 %vm2030_vm7, %v1870_v24  ;;  %v1384_v55 = vrot.slane %v1382_v18, 7  ;;  %v1682_v28 = vsel %vm1646_vm5, %v3551_v13, %v1539_v33  ;;  %v1187_v35 = vpack.c.bf16 %v1004_v26, %v1004_v26 }
 0x17c   : > { %v1767_v30 = vsel %vm1743_vm6, %v1682_v28, %v1605_v32 }
 0x17d   : > { %v1387_v29 = vor.u32 %v1385_v25, %v1384_v55  ;;  %v3840_v10 = vsel %vm3466_vm4, %v1384_v55, 0  ;;  %v1877_v41 = vshll.u32 %v1767_v30, 16  ;;  %v2374_v44 = vrot.slane %v1767_v30, 1 }
 0x17e   : > { %v1259_v47 = vunpack.c.l.b16 %v1187_v35  ;;  %v1688_v55 = vsel %vm1646_vm5, %v3580_v42, %v1543_v7 }
 0x17f   : > { %v3846_v14 = vsel %vm3466_vm4, 0, %v1387_v29  ;;  %v1879_v1 = vrot.slane %v1877_v41, 1 }
 0x180   : > { %1632 = vrot.lane.b32.xlu0 %v3840_v10, %s3293_s27  ;;  %v865_v34 = vpop.f32.mrf.mxu0  ;;  %1630 = vrot.lane.b32.xlu1 %v3846_v14, %s3293_s27 }
 0x181   : > { %v1005_v13 = vadd.f32 %v963_v27, %v865_v34 }
 0x182   : > { %v1603_v37 = vpop.permute.xlu0 %1602 }
 0x183   : > { %v1188_v38 = vpack.c.bf16 %v1005_v13, %v1005_v13  ;;  %v1765_v59 = vsel %vm1743_vm6, %v1679_v53, %v1603_v37 }
 0x184   : > { %v1873_v36 = vshll.u32 %v1765_v59, 16  ;;  %v2373_v45 = vrot.slane %v1765_v59, 1  ;;  %3015 = vmatmul.msk.bf16.gmra.mxu1 %vm2030_vm7, %v1765_v59  ;;  %v1871_v52 = vshrl.u32 %v1765_v59, 16 }
 0x185   : > { %v1260_v51 = vunpack.c.l.b16 %v1188_v38 }
 0x186   : > { %v1875_v57 = vrot.slane %v1873_v36, 1  ;;  %v2375_v60 = vsel %vm2357_vm8, %v2373_v45, %v2374_v44 }
 0x187   : > { %v1280_v61 = vpack.c.b16 %v1260_v51, %v1259_v47  ;;  %3067 = vmatmul.msk.bf16.gmra.mxu2 %vm2030_vm7, %v2375_v60 }
 0x188   : > { %1570 = vrot.lane.b32.xlu0 %v3840_v10, %s4168_s25  ;;  %v868_v15 = vpop.f32.mrf.mxu0  ;;  %v1876_v62 = vor.u32 %v1875_v57, %v1871_v52  ;;  %1568 = vrot.lane.b32.xlu1 %v3846_v14, %s4168_s25 }
 0x189   : > { %v1389_v2 = vshrl.u32 %v1280_v61, 16  ;;  %v1392_v5 = vshll.u32 %v1280_v61, 16  ;;  %v1006_v6 = vadd.f32 %v962_v9, %v868_v15  ;;  %v910_v9 = vpop.f32.mrf.mxu2 }
 0x18a   : > { %v1541_v11 = vpop.permute.xlu0 %1540  ;;  %v1880_v4 = vsel %vm1820_vm9, %v1876_v62, %v1879_v1  ;;  %v1611_v60 = vpop.permute.xlu2 %1610 }
 0x18b   : > { %2975 = vmatmul.msk.bf16.gmra.mxu3 %vm2030_vm7, %v1880_v4  ;;  %v1391_v46 = vrot.slane %v1389_v2, 7  ;;  %v1189_v24 = vpack.c.bf16 %v1006_v6, %v1006_v6  ;;  %v1685_v25 = vsel %vm1646_vm5, %v3584_v43, %v1541_v11 }
 0x18d   : > { %v1394_v58 = vor.u32 %v1392_v5, %v1391_v46  ;;  %v3869_v18 = vsel %vm3466_vm4, %v1391_v46, 0 }
 0x18f   : > { %v3865_v8 = vsel %vm3466_vm4, 0, %v1394_v58 }
 0x190   : > { %1634 = vrot.lane.b32.xlu2 %v3865_v8, %s3293_s27  ;;  %v870_v31 = vpop.f32.mrf.mxu0  ;;  %1636 = vrot.lane.b32.xlu1 %v3869_v18, %s3293_s27 }
 0x191   : > { %v1007_v33 = vadd.f32 %v963_v27, %v870_v31  ;;  %v1261_v27 = vunpack.c.l.b16 %v1189_v24 }
 0x192   : > { %v1609_v26 = vpop.permute.xlu0 %1608  ;;  %v1607_v28 = vpop.permute.xlu1 %1606 }
 0x193   : > { %v1190_v29 = vpack.c.bf16 %v1007_v33, %v1007_v33  ;;  %v1771_v32 = vsel %vm1743_vm6, %v1688_v55, %v1609_v26  ;;  %v1769_v34 = vsel %vm1743_vm6, %v1685_v25, %v1607_v28  ;;  %v1549_v58 = vpop.permute.xlu2 %1548 }
 0x194   : > { %v1887_v35 = vshll.u32 %v1771_v32, 16  ;;  %v2377_v30 = vrot.slane %v1771_v32, 1  ;;  %v1883_v13 = vshll.u32 %v1769_v34, 16  ;;  %3016 = vmatmul.msk.bf16.gmra.mxu1 %vm2030_vm7, %v1769_v34  ;;  %v2376_v37 = vrot.slane %v1769_v34, 1 }
 0x195   : > { %v1262_v53 = vunpack.c.l.b16 %v1190_v29  ;;  %v1881_v38 = vshrl.u32 %v1769_v34, 16  ;;  %v1697_v28 = vsel %vm1646_vm5, %v3674_v56, %v1549_v58 }
 0x196   : > { %v1885_v42 = vrot.slane %v1883_v13, 1  ;;  %v2378_v43 = vsel %vm2357_vm8, %v2376_v37, %v2377_v30  ;;  %v1889_v41 = vrot.slane %v1887_v35, 1 }
 0x197   : > { %v1281_v59 = vpack.c.b16 %v1262_v53, %v1261_v27  ;;  %3068 = vmatmul.msk.bf16.gmra.mxu2 %vm2030_vm7, %v2378_v43 }
 0x198   : > { %1572 = vrot.lane.b32.xlu2 %v3865_v8, %s4168_s25  ;;  %v1886_v44 = vor.u32 %v1885_v42, %v1881_v38  ;;  %1574 = vrot.lane.b32.xlu1 %v3869_v18, %s4168_s25 }
 0x199   : > { %v1396_v36 = vshrl.u32 %v1281_v59, 16  ;;  %v1399_v51 = vshll.u32 %v1281_v59, 16 }
 0x19a   : > { %v1545_v45 = vpop.permute.xlu1 %1544  ;;  %v1890_v47 = vsel %vm1820_vm9, %v1886_v44, %v1889_v41  ;;  %v1547_v15 = vpop.permute.xlu0 %1546 }
 0x19b   : > { %v1691_v52 = vsel %vm1646_vm5, %v3643_v21, %v1545_v45  ;;  %2976 = vmatmul.msk.bf16.gmra.mxu3 %vm2030_vm7, %v1890_v47  ;;  %v1398_v57 = vrot.slane %v1396_v36, 7  ;;  %v1694_v21 = vsel %vm1646_vm5, %v3639_v20, %v1547_v15  ;;  %v1617_v55 = vpop.permute.xlu2 %1616  ;;  %v3930_v36 = vld [vmem:[%s4160_s9] ss:$0 sm:$0xff] }
 0x19c   : > { %v1773_v1 = vsel %vm1743_vm6, %v1691_v52, %v1611_v60 }
 0x19d   : > { %v1401_v61 = vor.u32 %v1399_v51, %v1398_v57  ;;  %v1482_v62 = vsel %vm3466_vm4, %v1398_v57, 0  ;;  %v1893_v3 = vshll.u32 %v1773_v1, 16  ;;  %v2379_v49 = vrot.slane %v1773_v1, 1 }
 0x19e   : > { %v1891_v31 = vshrl.u32 %v1773_v1, 16 }
 0x19f   : > { %v1464_v2 = vsel %vm3466_vm4, 0, %v1401_v61  ;;  %v1895_v6 = vrot.slane %v1893_v3, 1 }
 0x1a0   : > { %1640 = vrot.lane.b32.xlu2 %v1482_v62, %s3293_s27  ;;  %1638 = vrot.lane.b32.xlu0 %v1464_v2, %s3293_s27 }
 0x1a1   : > { %1642 = vrot.lane.b32.xlu1 %v3690_v19, %s3293_s27  ;;  %v1896_v19 = vor.u32 %v1895_v6, %v1891_v31 }
 0x1a2   : > { %v1613_v11 = vpop.permute.xlu1 %1612 }
 0x1a3   : > { %v1775_v4 = vsel %vm1743_vm6, %v1694_v21, %v1613_v11  ;;  %v1555_v41 = vpop.permute.xlu2 %1554 }
 0x1a4   : > { %v1897_v5 = vshll.u32 %v1775_v4, 16  ;;  %v2380_v46 = vrot.slane %v1775_v4, 1  ;;  %3017 = vmatmul.msk.bf16.gmra.mxu1 %vm2030_vm7, %v1773_v1  ;;  %v1706_v51 = vsel %vm1646_vm5, %v3694_v22, %v1555_v41 }
 0x1a6   : > { %v1899_v7 = vrot.slane %v1897_v5, 1  ;;  %v2381_v24 = vsel %vm2357_vm8, %v2379_v49, %v2380_v46 }
 0x1a7   : > { %3069 = vmatmul.msk.bf16.gmra.mxu2 %vm2030_vm7, %v2381_v24 }
 0x1a8   : > { %1578 = vrot.lane.b32.xlu2 %v1482_v62, %s4168_s25  ;;  %1576 = vrot.lane.b32.xlu0 %v1464_v2, %s4168_s25  ;;  %v1900_v20 = vsel %vm1820_vm9, %v1896_v19, %v1899_v7  ;;  %s2710_s25 = sshll.u32 %s2707_s29, 4  ;;  %s2711_s25 = int_to_ptr.hbm [resolvable:$true] %s2710_s25 }
 0x1a9   : > { %s3226_s26 = sshra.s32 %s2711_s25, 4  ;;  %s3227_s26 = int_to_ptr.hbm [resolvable:$true] %s3226_s26 }
 0x1aa   : > { %v1551_v33 = vpop.permute.xlu1 %1550  ;;  %s3228_s18 = scalar_lea.hbm %s3227_s26, 256  ;;  %p3233_p1 = scmp.lt.s32.totalorder %s3227_s26, %s4161_s10 }
 0x1ab   : > { %2977 = vmatmul.msk.bf16.gmra.mxu3 %vm2030_vm7, %v1900_v20  ;;  %v1700_v9 = vsel %vm1646_vm5, %v3670_v54, %v1551_v33  ;;  %p3229_p12 = scmp.ne.s32.totalorder %s3227_s26, %s3228_s18  ;;  %p3234_p2 = scmp.lt.s32.totalorder %s3232_s28, %s3228_s18 }
 0x1ac   : > { %v1779_v25 = vsel %vm1743_vm6, %v1700_v9, %v1617_v55 }
 0x1ad   : > { %v1907_v34 = vshll.u32 %v1779_v25, 16  ;;  %v2383_v35 = vrot.slane %v1779_v25, 1  ;;  %p3230_p13 = pnand %p3229_p12, %p3392_p4  ;;  %p3235_p3 = por %p3234_p2, %p3233_p1 }
 0x1af   : > { %p3231_p0 = pneg %p3230_p13 }
 0x1b0   : > { %1644 = vrot.lane.b32.xlu0 %v3686_v16, %s3293_s27  ;;  %v1909_v16 = vrot.slane %v1907_v34, 1  ;;  %s2903_s27 = sshll.u32 %s585_s20, 8 }
 0x1b1   : > { %v2245_v26 = vpop.f32.mrf.mxu1  ;;  %s3939_s30 = scalar_lea.vmem [#allocation2], %s2903_s27  ;;  %p3236_p5 = pnand %p3235_p3, %p3231_p0 }
 0x1b2   : > { %v1615_v29 = vpop.permute.xlu0 %1614  ;;  %s2708_s27 = sshll.u32 %s3939_s30, 4  ;;  %s2709_s27 = int_to_ptr.vmem [resolvable:$true] %s2708_s27 }
 0x1b3   : > { %v1777_v32 = vsel %vm1743_vm6, %v1697_v28, %v1615_v29 }
 0x1b4   : > { %v1903_v30 = vshll.u32 %v1777_v32, 16  ;;  %v2382_v13 = vrot.slane %v1777_v32, 1  ;;  %3018 = vmatmul.msk.bf16.gmra.mxu1 %vm2030_vm7, %v1777_v32  ;;  %v1901_v54 = vshrl.u32 %v1777_v32, 16 }
 0x1b6   : > { %v1905_v27 = vrot.slane %v1903_v30, 1  ;;  %v2384_v53 = vsel %vm2357_vm8, %v2382_v13, %v2383_v35 }
 0x1b7   : > { %3070 = vmatmul.msk.bf16.gmra.mxu2 %vm2030_vm7, %v2384_v53 }
 0x1b8   : > { %v1906_v37 = vor.u32 %v1905_v27, %v1901_v54 }
 0x1b9   : > { %v2247_v56 = vpop.f32.mrf.mxu1 }
 0x1ba   : > { %v2512_v38 = vpop.f32.mrf.mxu2  ;;  %v1553_v42 = vpop.permute.xlu0 %1552  ;;  %v1910_v59 = vsel %vm1820_vm9, %v1906_v37, %v1909_v16 }
 0x1bb   : > { %2978 = vmatmul.msk.bf16.gmra.mxu3 %vm2030_vm7, %v1910_v59  ;;  %v1703_v60 = vsel %vm1646_vm5, %v3698_v23, %v1553_v42  ;;  %v1623_v33 = vpop.permute.xlu2 %1622 }
 0x1be   : > { %v2088_v43 = vpop.f32.mrf.mxu3 }
 0x1bf   : > { %v2246_v44 = vadd.f32 %v2245_v26, %v2088_v43 }
 0x1c1   : > { %v2592_v45 = vadd.f32 %v2512_v38, %v2246_v44  ;;  %v2250_v47 = vpop.f32.mrf.mxu1 }
 0x1c2   : > { %v2514_v52 = vpop.f32.mrf.mxu2  ;;  %v1621_v57 = vpop.permute.xlu0 %1620 }
 0x1c3   : > { %v2628_v61 = vadd.f32 %v3930_v36, %v2592_v45  ;;  %v1783_v1 = vsel %vm1743_vm6, %v1706_v51, %v1621_v57  ;;  %v1619_v15 = vpop.permute.xlu1 %1618 }
 0x1c4   : > { %v2386_v62 = vrot.slane %v1783_v1, 1  ;;  %v1781_v2 = vsel %vm1743_vm6, %v1703_v60, %v1619_v15  ;;  %v1917_v3 = vshll.u32 %v1783_v1, 16 }
 0x1c5   : > { %2660 = vst.msk [vmem:[%s3939_s30] sm:$0xff] %vm1646_vm5, %v2628_v61  ;;  %v1913_v22 = vshll.u32 %v1781_v2, 16  ;;  %v2385_v21 = vrot.slane %v1781_v2, 1  ;;  %3019 = vmatmul.msk.bf16.gmra.mxu1 %vm2030_vm7, %v1781_v2  ;;  %v1911_v23 = vshrl.u32 %v1781_v2, 16 }
 0x1c6   : > { %v2090_v11 = vpop.f32.mrf.mxu3  ;;  %v1919_v6 = vrot.slane %v1917_v3, 1 }
 0x1c7   : > { %v1915_v4 = vrot.slane %v1913_v22, 1  ;;  %v2248_v5 = vadd.f32 %v2247_v56, %v2090_v11  ;;  %v2387_v46 = vsel %vm2357_vm8, %v2385_v21, %v2386_v62  ;;  %v1561_v56 = vpop.permute.xlu2 %1560 }
 0x1c8   : > { %3071 = vmatmul.msk.bf16.gmra.mxu2 %vm2030_vm7, %v2387_v46  ;;  %v1715_v22 = vsel %vm1646_vm5, %v3757_v0, %v1561_v56 }
 0x1c9   : > { %v2593_v49 = vadd.f32 %v2514_v52, %v2248_v5  ;;  %v2252_v58 = vpop.f32.mrf.mxu1  ;;  %v1916_v7 = vor.u32 %v1915_v4, %v1911_v23 }
 0x1ca   : > { %v2517_v31 = vpop.f32.mrf.mxu2  ;;  %v1559_v28 = vpop.permute.xlu0 %1558 }
 0x1cb   : > { %v2629_v24 = vadd.f32 %v3930_v36, %v2593_v49  ;;  %v1557_v19 = vpop.permute.xlu1 %1556  ;;  %v1920_v20 = vsel %vm1820_vm9, %v1916_v7, %v1919_v6  ;;  %v1712_v30 = vsel %vm1646_vm5, %v3727_v12, %v1559_v28 }
 0x1cc   : > { %v1709_v9 = vsel %vm1646_vm5, %v3731_v17, %v1557_v19  ;;  %2979 = vmatmul.msk.bf16.gmra.mxu3 %vm2030_vm7, %v1920_v20 }
 0x1cd   : > { %2661 = vst.msk [vmem:[%s3939_s30 + $0x8] sm:$0xff] %vm1646_vm5, %v2629_v24  ;;  %v1785_v25 = vsel %vm1743_vm6, %v1709_v9, %v1623_v33 }
 0x1ce   : > { %v2093_v55 = vpop.f32.mrf.mxu3  ;;  %v1923_v34 = vshll.u32 %v1785_v25, 16  ;;  %v2388_v37 = vrot.slane %v1785_v25, 1  ;;  %v1921_v59 = vshrl.u32 %v1785_v25, 16 }
 0x1cf   : > { %v2251_v26 = vadd.f32 %v2250_v47, %v2093_v55  ;;  %v1629_v15 = vpop.permute.xlu2 %1628 }
 0x1d0   : > { %v1925_v16 = vrot.slane %v1923_v34, 1 }
 0x1d1   : > { %v2594_v29 = vadd.f32 %v2517_v31, %v2251_v26  ;;  %v2255_v32 = vpop.f32.mrf.mxu1 }
 0x1d2   : > { %v2519_v35 = vpop.f32.mrf.mxu2  ;;  %v1926_v45 = vor.u32 %v1925_v16, %v1921_v59 }
 0x1d3   : > { %v2630_v13 = vadd.f32 %v3930_v36, %v2594_v29  ;;  %v1625_v54 = vpop.permute.xlu1 %1624 }
 0x1d4   : > { %v1787_v17 = vsel %vm1743_vm6, %v1712_v30, %v1625_v54 }
 0x1d5   : > { %2662 = vst.msk [vmem:[%s3939_s30 + $0x10] sm:$0xff] %vm1646_vm5, %v2630_v13  ;;  %v1927_v27 = vshll.u32 %v1787_v17, 16  ;;  %v2389_v53 = vrot.slane %v1787_v17, 1  ;;  %3020 = vmatmul.msk.bf16.gmra.mxu1 %vm2030_vm7, %v1785_v25 }
 0x1d6   : > { %v2095_v38 = vpop.f32.mrf.mxu3 }
 0x1d7   : > { %v1929_v42 = vrot.slane %v1927_v27, 1  ;;  %v2253_v43 = vadd.f32 %v2252_v58, %v2095_v38  ;;  %v2390_v12 = vsel %vm2357_vm8, %v2388_v37, %v2389_v53  ;;  %v1567_v29 = vpop.permute.xlu2 %1566 }
 0x1d8   : > { %3072 = vmatmul.msk.bf16.gmra.mxu2 %vm2030_vm7, %v2390_v12  ;;  %v1724_v30 = vsel %vm1646_vm5, %v3781_v48, %v1567_v29 }
 0x1d9   : > { %v2595_v41 = vadd.f32 %v2519_v35, %v2253_v43  ;;  %v2257_v44 = vpop.f32.mrf.mxu1  ;;  %v1930_v57 = vsel %vm1820_vm9, %v1926_v45, %v1929_v42 }
 0x1da   : > { %v2522_v47 = vpop.f32.mrf.mxu2 }
 0x1db   : > { %v2631_v51 = vadd.f32 %v3930_v36, %v2595_v41  ;;  %v1563_v52 = vpop.permute.xlu1 %1562 }
 0x1dc   : > { %2980 = vmatmul.msk.bf16.gmra.mxu3 %vm2030_vm7, %v1930_v57  ;;  %v1718_v60 = vsel %vm1646_vm5, %v3753_v63, %v1563_v52 }
 0x1dd   : > { %2663 = vst.msk [vmem:[%s3939_s30 + $0x18] sm:$0xff] %vm1646_vm5, %v2631_v51  ;;  %v1791_v62 = vsel %vm1743_vm6, %v1718_v60, %v1629_v15 }
 0x1de   : > { %v2098_v61 = vpop.f32.mrf.mxu3  ;;  %v1937_v5 = vshll.u32 %v1791_v62, 16  ;;  %v2392_v46 = vrot.slane %v1791_v62, 1 }
 0x1df   : > { %v2256_v1 = vadd.f32 %v2255_v32, %v2098_v61 }
 0x1e0   : > { %v1939_v24 = vrot.slane %v1937_v5, 1 }
 0x1e1   : > { %v2596_v2 = vadd.f32 %v2522_v47, %v2256_v1  ;;  %v2260_v3 = vpop.f32.mrf.mxu1 }
 0x1e2   : > { %v2524_v21 = vpop.f32.mrf.mxu2  ;;  %v1627_v11 = vpop.permute.xlu0 %1626 }
 0x1e3   : > { %v2632_v23 = vadd.f32 %v3930_v36, %v2596_v2  ;;  %v1789_v4 = vsel %vm1743_vm6, %v1715_v22, %v1627_v11 }
 0x1e4   : > { %v1933_v63 = vshll.u32 %v1789_v4, 16  ;;  %v2391_v6 = vrot.slane %v1789_v4, 1  ;;  %v1931_v49 = vshrl.u32 %v1789_v4, 16 }
 0x1e5   : > { %2664 = vst.msk [vmem:[%s3939_s30 + $0x20] sm:$0xff] %vm1646_vm5, %v2632_v23  ;;  %3021 = vmatmul.msk.bf16.gmra.mxu1 %vm2030_vm7, %v1789_v4 }
 0x1e6   : > { %v1935_v58 = vrot.slane %v1933_v63, 1  ;;  %v2100_v7 = vpop.f32.mrf.mxu3  ;;  %v2393_v0 = vsel %vm2357_vm8, %v2391_v6, %v2392_v46 }
 0x1e7   : > { %v2258_v31 = vadd.f32 %v2257_v44, %v2100_v7 }
 0x1e8   : > { %3073 = vmatmul.msk.bf16.gmra.mxu2 %vm2030_vm7, %v2393_v0  ;;  %v1936_v19 = vor.u32 %v1935_v58, %v1931_v49 }
 0x1e9   : > { %v2597_v20 = vadd.f32 %v2524_v21, %v2258_v31  ;;  %v2262_v33 = vpop.f32.mrf.mxu1 }
 0x1ea   : > { %v1565_v9 = vpop.permute.xlu0 %1564  ;;  %v1940_v55 = vsel %vm1820_vm9, %v1936_v19, %v1939_v24  ;;  %v2527_v26 = vpop.f32.mrf.mxu2 }
 0x1eb   : > { %v2633_v25 = vadd.f32 %v3930_v36, %v2597_v20  ;;  %v1721_v54 = vsel %vm1646_vm5, %v3785_v50, %v1565_v9  ;;  %v1635_v1 = vpop.permute.xlu2 %1634 }
 0x1ec   : > { %2981 = vmatmul.msk.bf16.gmra.mxu3 %vm2030_vm7, %v1940_v55 }
 0x1ed   : > { %2665 = vst.msk [vmem:[%s3939_s30 + $0x28] sm:$0xff] %vm1646_vm5, %v2633_v25 }
 0x1ee   : > { %v2103_v28 = vpop.f32.mrf.mxu3 }
 0x1ef   : > { %v2261_v32 = vadd.f32 %v2260_v3, %v2103_v28 }
 0x1f1   : > { %v2598_v34 = vadd.f32 %v2527_v26, %v2261_v32  ;;  %v2265_v35 = vpop.f32.mrf.mxu1 }
 0x1f2   : > { %v1633_v13 = vpop.permute.xlu0 %1632  ;;  %v2529_v27 = vpop.f32.mrf.mxu2 }
 0x1f3   : > { %v2634_v17 = vadd.f32 %v3930_v36, %v2598_v34  ;;  %v1795_v53 = vsel %vm1743_vm6, %v1724_v30, %v1633_v13  ;;  %v1631_v16 = vpop.permute.xlu1 %1630  ;;  %v1573_v0 = vpop.permute.xlu2 %1572  ;;  %v873_v13 = vld [vmem:[%s611_s22] sm:$0xff] }
 0x1f4   : > { %v2395_v37 = vrot.slane %v1795_v53, 1  ;;  %v1793_v56 = vsel %vm1743_vm6, %v1721_v54, %v1631_v16  ;;  %v1947_v38 = vshll.u32 %v1795_v53, 16  ;;  %v874_v54 = vld [vmem:[%s611_s22 + $0x8] sm:$0xff] }
 0x1f5   : > { %2666 = vst.msk [vmem:[%s3939_s30 + $0x30] sm:$0xff] %vm1646_vm5, %v2634_v17  ;;  %v1943_v42 = vshll.u32 %v1793_v56, 16  ;;  %v2394_v59 = vrot.slane %v1793_v56, 1  ;;  %3022 = vmatmul.msk.bf16.gmra.mxu1 %vm2030_vm7, %v1793_v56  ;;  %v1941_v43 = vshrl.u32 %v1793_v56, 16  ;;  %v875_v16 = vpack.c.bf16 %v874_v54, %v873_v13 }
 0x1f6   : > { %v2105_v48 = vpop.f32.mrf.mxu3  ;;  %v1949_v44 = vrot.slane %v1947_v38, 1 }
 0x1f7   : > { %v1945_v50 = vrot.slane %v1943_v42, 1  ;;  %v2263_v12 = vadd.f32 %v2262_v33, %v2105_v48  ;;  %v2396_v41 = vsel %vm2357_vm8, %v2394_v59, %v2395_v37  ;;  %v1733_v37 = vsel %vm1646_vm5, %v3846_v14, %v1573_v0  ;;  %2932 = vmatmul.msk.bf16.vlgmr.msrb.gmra.mxu0 %vm731_vm1, %v875_v16 }
 0x1f8   : > { %3074 = vmatmul.msk.bf16.gmra.mxu2 %vm2030_vm7, %v2396_v41 }
 0x1f9   : > { %v1946_v45 = vor.u32 %v1945_v50, %v1941_v43  ;;  %v2599_v47 = vadd.f32 %v2529_v27, %v2263_v12  ;;  %v2267_v51 = vpop.f32.mrf.mxu1 }
 0x1fa   : > { %v2532_v57 = vpop.f32.mrf.mxu2  ;;  %v1571_v22 = vpop.permute.xlu0 %1570 }
 0x1fb   : > { %v2635_v52 = vadd.f32 %v3930_v36, %v2599_v47  ;;  %v1569_v60 = vpop.permute.xlu1 %1568  ;;  %v1950_v61 = vsel %vm1820_vm9, %v1946_v45, %v1949_v44  ;;  %v1730_v4 = vsel %vm1646_vm5, %v3815_v40, %v1571_v22  ;;  %v1641_v30 = vpop.permute.xlu2 %1640 }
 0x1fc   : > { %v1727_v15 = vsel %vm1646_vm5, %v3811_v39, %v1569_v60  ;;  %2982 = vmatmul.msk.bf16.gmra.mxu3 %vm2030_vm7, %v1950_v61 }
 0x1fd   : > { %2667 = vst.msk [vmem:[%s3939_s30 + $0x38] sm:$0xff] %vm1646_vm5, %v2635_v52  ;;  %v1797_v2 = vsel %vm1743_vm6, %v1727_v15, %v1635_v1 }
 0x1fe   : > { %v2108_v62 = vpop.f32.mrf.mxu3  ;;  %v1953_v23 = vshll.u32 %v1797_v2, 16  ;;  %v2397_v7 = vrot.slane %v1797_v2, 1  ;;  %v1951_v40 = vshrl.u32 %v1797_v2, 16 }
 0x1ff   : > { %v2266_v3 = vadd.f32 %v2265_v35, %v2108_v62 }
 0x200   : > { %v1955_v58 = vrot.slane %v1953_v23, 1 }
 0x201   : > { %v2600_v21 = vadd.f32 %v2532_v57, %v2266_v3  ;;  %v2270_v11 = vpop.f32.mrf.mxu1 }
 0x202   : > { %v2534_v46 = vpop.f32.mrf.mxu2  ;;  %v1956_v55 = vor.u32 %v1955_v58, %v1951_v40 }
 0x203   : > { %v2636_v5 = vadd.f32 %v3930_v36, %v2600_v21  ;;  %v1637_v63 = vpop.permute.xlu1 %1636 }
 0x204   : > { %v1799_v39 = vsel %vm1743_vm6, %v1730_v4, %v1637_v63 }
 0x205   : > { %2668 = vst.msk [vmem:[%s3939_s30 + $0x40] sm:$0xff] %vm1646_vm5, %v2636_v5  ;;  %v1957_v6 = vshll.u32 %v1799_v39, 16  ;;  %v2398_v49 = vrot.slane %v1799_v39, 1  ;;  %3023 = vmatmul.msk.bf16.gmra.mxu1 %vm2030_vm7, %v1797_v2 }
 0x206   : > { %v2110_v31 = vpop.f32.mrf.mxu3 }
 0x207   : > { %v1959_v24 = vrot.slane %v1957_v6, 1  ;;  %v2268_v19 = vadd.f32 %v2267_v51, %v2110_v31  ;;  %v2399_v20 = vsel %vm2357_vm8, %v2397_v7, %v2398_v49 }
 0x208   : > { %3075 = vmatmul.msk.bf16.gmra.mxu2 %vm2030_vm7, %v2399_v20 }
 0x209   : > { %v2601_v33 = vadd.f32 %v2534_v46, %v2268_v19  ;;  %v2272_v9 = vpop.f32.mrf.mxu1  ;;  %v1960_v29 = vsel %vm1820_vm9, %v1956_v55, %v1959_v24 }
 0x20a   : > { %v2537_v26 = vpop.f32.mrf.mxu2 }
 0x20b   : > { %v2637_v25 = vadd.f32 %v3930_v36, %v2601_v33  ;;  %v1575_v28 = vpop.permute.xlu1 %1574 }
 0x20c   : > { %2983 = vmatmul.msk.bf16.gmra.mxu3 %vm2030_vm7, %v1960_v29  ;;  %v1736_v32 = vsel %vm1646_vm5, %v3840_v10, %v1575_v28 }
 0x20d   : > { %2669 = vst.msk [vmem:[%s3939_s30 + $0x48] sm:$0xff] %vm1646_vm5, %v2637_v25  ;;  %v1803_v17 = vsel %vm1743_vm6, %v1736_v32, %v1641_v30 }
 0x20e   : > { %v2113_v34 = vpop.f32.mrf.mxu3  ;;  %v1967_v59 = vshll.u32 %v1803_v17, 16  ;;  %v2401_v48 = vrot.slane %v1803_v17, 1 }
 0x20f   : > { %v2271_v35 = vadd.f32 %v2270_v11, %v2113_v34  ;;  %v1579_v11 = vpop.permute.xlu2 %1578 }
 0x210   : > { %v1969_v47 = vrot.slane %v1967_v59, 1  ;;  %v1742_v46 = vsel %vm1646_vm5, %v3869_v18, %v1579_v11 }
 0x211   : > { %v2602_v27 = vadd.f32 %v2537_v26, %v2271_v35  ;;  %v2275_v53 = vpop.f32.mrf.mxu1 }
 0x212   : > { %v1639_v56 = vpop.permute.xlu0 %1638  ;;  %v2539_v42 = vpop.f32.mrf.mxu2 }
 0x213   : > { %v2638_v38 = vadd.f32 %v3930_v36, %v2602_v27  ;;  %v1801_v10 = vsel %vm1743_vm6, %v1733_v37, %v1639_v56  ;;  %v1643_v60 = vpop.permute.xlu1 %1642 }
 0x214   : > { %v1963_v43 = vshll.u32 %v1801_v10, 16  ;;  %v2400_v50 = vrot.slane %v1801_v10, 1  ;;  %v1961_v12 = vshrl.u32 %v1801_v10, 16 }
 0x215   : > { %2670 = vst.msk [vmem:[%s3939_s30 + $0x50] sm:$0xff] %vm1646_vm5, %v2638_v38  ;;  %3024 = vmatmul.msk.bf16.gmra.mxu1 %vm2030_vm7, %v1801_v10 }
 0x216   : > { %v1965_v41 = vrot.slane %v1963_v43, 1  ;;  %v2115_v14 = vpop.f32.mrf.mxu3  ;;  %v2402_v44 = vsel %vm2357_vm8, %v2400_v50, %v2401_v48 }
 0x217   : > { %v2273_v45 = vadd.f32 %v2272_v9, %v2115_v14 }
 0x218   : > { %v1966_v51 = vor.u32 %v1965_v41, %v1961_v12  ;;  %3076 = vmatmul.msk.bf16.gmra.mxu2 %vm2030_vm7, %v2402_v44 }
 0x219   : > { %v2603_v52 = vadd.f32 %v2539_v42, %v2273_v45  ;;  %v2277_v57 = vpop.f32.mrf.mxu1 }
 0x21a   : > { %v1970_v61 = vsel %vm1820_vm9, %v1966_v51, %v1969_v47  ;;  %v2542_v15 = vpop.f32.mrf.mxu2  ;;  %v1577_v62 = vpop.permute.xlu0 %1576 }
 0x21b   : > { %v2639_v1 = vadd.f32 %v3930_v36, %v2603_v52  ;;  %v1739_v2 = vsel %vm1646_vm5, %v3865_v8, %v1577_v62 }
 0x21c   : > { %2984 = vmatmul.msk.bf16.gmra.mxu3 %vm2030_vm7, %v1970_v61  ;;  %v1805_v3 = vsel %vm1743_vm6, %v1739_v2, %v1643_v60 }
 0x21d   : > { %2671 = vst.msk [vmem:[%s3939_s30 + $0x58] sm:$0xff] %vm1646_vm5, %v2639_v1  ;;  %v1973_v23 = vshll.u32 %v1805_v3, 16  ;;  %v2403_v58 = vrot.slane %v1805_v3, 1  ;;  %v1971_v24 = vshrl.u32 %v1805_v3, 16 }
 0x21e   : > { %v2118_v22 = vpop.f32.mrf.mxu3 }
 0x21f   : > { %v2276_v21 = vadd.f32 %v2275_v53, %v2118_v22  ;;  %v1975_v49 = vrot.slane %v1973_v23, 1 }
 0x221   : > { %v2604_v4 = vadd.f32 %v2542_v15, %v2276_v21  ;;  %v2280_v5 = vpop.f32.mrf.mxu1  ;;  %v1976_v20 = vor.u32 %v1975_v49, %v1971_v24 }
 0x222   : > { %v2544_v39 = vpop.f32.mrf.mxu2  ;;  %v1645_v8 = vpop.permute.xlu0 %1644 }
 0x223   : > { %v2640_v63 = vadd.f32 %v3930_v36, %v2604_v4  ;;  %v1807_v6 = vsel %vm1743_vm6, %v1742_v46, %v1645_v8 }
 0x224   : > { %v1977_v7 = vshll.u32 %v1807_v6, 16  ;;  %v2404_v0 = vrot.slane %v1807_v6, 1 }
 0x225   : > { %2672 = vst.msk [vmem:[%s3939_s30 + $0x60] sm:$0xff] %vm1646_vm5, %v2640_v63  ;;  %3025 = vmatmul.msk.bf16.gmra.mxu1 %vm2030_vm7, %v1805_v3 }
 0x226   : > { %v2120_v31 = vpop.f32.mrf.mxu3  ;;  %v1979_v40 = vrot.slane %v1977_v7, 1  ;;  %v2405_v18 = vsel %vm2357_vm8, %v2403_v58, %v2404_v0 }
 0x227   : > { %v2278_v19 = vadd.f32 %v2277_v57, %v2120_v31 }
 0x228   : > { %3077 = vmatmul.msk.bf16.gmra.mxu2 %vm2030_vm7, %v2405_v18  ;;  %v1980_v26 = vsel %vm1820_vm9, %v1976_v20, %v1979_v40 }
 0x229   : > { %v2605_v33 = vadd.f32 %v2544_v39, %v2278_v19  ;;  %v2282_v9 = vpop.f32.mrf.mxu1 }
 0x22a   : > { %v2547_v25 = vpop.f32.mrf.mxu2 }
 0x22b   : > { %v2641_v55 = vadd.f32 %v3930_v36, %v2605_v33 }
 0x22c   : > { %2985 = vmatmul.msk.bf16.gmra.mxu3 %vm2030_vm7, %v1980_v26 }
 0x22d   : > { %2673 = vst.msk [vmem:[%s3939_s30 + $0x68] sm:$0xff] %vm1646_vm5, %v2641_v55 }
 0x22e   : > { %v2123_v28 = vpop.f32.mrf.mxu3 }
 0x22f   : > { %v2281_v29 = vadd.f32 %v2280_v5, %v2123_v28 }
 0x231   : > { %v2606_v32 = vadd.f32 %v2547_v25, %v2281_v29  ;;  %v2285_v34 = vpop.f32.mrf.mxu1 }
 0x232   : > { %v2549_v30 = vpop.f32.mrf.mxu2 }
 0x233   : > { %v2642_v35 = vadd.f32 %v3930_v36, %v2606_v32 }
 0x235   : > { %2674 = vst.msk [vmem:[%s3939_s30 + $0x70] sm:$0xff] %vm1646_vm5, %v2642_v35 }
 0x236   : > { %v2125_v13 = vpop.f32.mrf.mxu3 }
 0x237   : > { %v2283_v54 = vadd.f32 %v2282_v9, %v2125_v13 }
 0x239   : > { %v2607_v17 = vadd.f32 %v2549_v30, %v2283_v54  ;;  %v2287_v27 = vpop.f32.mrf.mxu1 }
 0x23a   : > { %v2552_v16 = vpop.f32.mrf.mxu2 }
 0x23b   : > { %v2643_v53 = vadd.f32 %v3930_v36, %v2607_v17 }
 0x23d   : > { %2675 = vst.msk [vmem:[%s3939_s30 + $0x78] sm:$0xff] %vm1646_vm5, %v2643_v53 }
 0x23e   : > { %v2128_v37 = vpop.f32.mrf.mxu3 }
 0x23f   : > { %v2286_v56 = vadd.f32 %v2285_v34, %v2128_v37 }
 0x241   : > { %v2608_v38 = vadd.f32 %v2552_v16, %v2286_v56 }
 0x242   : > { %v2290_v42 = vpop.f32.mrf.mxu1  ;;  %v2554_v59 = vpop.f32.mrf.mxu2 }
 0x243   : > { %v2644_v10 = vadd.f32 %v3930_v36, %v2608_v38 }
 0x245   : > { %2676 = vst.msk [vmem:[%s3939_s30 + $0x80] sm:$0xff] %vm1646_vm5, %v2644_v10 }
 0x246   : > { %v2130_v48 = vpop.f32.mrf.mxu3 }
 0x247   : > { %v2288_v43 = vadd.f32 %v2287_v27, %v2130_v48 }
 0x249   : > { %v2609_v50 = vadd.f32 %v2554_v59, %v2288_v43 }
 0x24a   : > { %v2292_v12 = vpop.f32.mrf.mxu1 }
 0x24b   : > { %v2645_v41 = vadd.f32 %v3930_v36, %v2609_v50  ;;  %v2557_v14 = vpop.f32.mrf.mxu2 }
 0x24d   : > { %2677 = vst.msk [vmem:[%s3939_s30 + $0x88] sm:$0xff] %vm1646_vm5, %v2645_v41 }
 0x24f   : > { %v2133_v44 = vpop.f32.mrf.mxu3 }
 0x250   : > { %v2291_v45 = vadd.f32 %v2290_v42, %v2133_v44 }
 0x252   : > { %v2610_v47 = vadd.f32 %v2557_v14, %v2291_v45  ;;  %v2295_v51 = vpop.f32.mrf.mxu1 }
 0x253   : > { %v2559_v52 = vpop.f32.mrf.mxu2 }
 0x254   : > { %v2646_v57 = vadd.f32 %v3930_v36, %v2610_v47 }
 0x256   : > { %2678 = vst.msk [vmem:[%s3939_s30 + $0x90] sm:$0xff] %vm1646_vm5, %v2646_v57 }
 0x257   : > { %v2135_v60 = vpop.f32.mrf.mxu3 }
 0x258   : > { %v2293_v61 = vadd.f32 %v2292_v12, %v2135_v60 }
 0x25a   : > { %v2611_v1 = vadd.f32 %v2559_v52, %v2293_v61  ;;  %v2297_v15 = vpop.f32.mrf.mxu1 }
 0x25b   : > { %v2562_v62 = vpop.f32.mrf.mxu2 }
 0x25c   : > { %v2647_v2 = vadd.f32 %v3930_v36, %v2611_v1 }
 0x25e   : > { %2679 = vst.msk [vmem:[%s3939_s30 + $0x98] sm:$0xff] %vm1646_vm5, %v2647_v2 }
 0x25f   : > { %v2138_v3 = vpop.f32.mrf.mxu3 }
 0x260   : > { %v2296_v22 = vadd.f32 %v2295_v51, %v2138_v3 }
 0x262   : > { %v2612_v21 = vadd.f32 %v2562_v62, %v2296_v22  ;;  %v2300_v11 = vpop.f32.mrf.mxu1 }
 0x263   : > { %v2564_v23 = vpop.f32.mrf.mxu2 }
 0x264   : > { %v2648_v4 = vadd.f32 %v3930_v36, %v2612_v21 }
 0x266   : > { %2680 = vst.msk [vmem:[%s3939_s30 + $0xa0] sm:$0xff] %vm1646_vm5, %v2648_v4 }
 0x267   : > { %v2140_v5 = vpop.f32.mrf.mxu3 }
 0x268   : > { %v2298_v46 = vadd.f32 %v2297_v15, %v2140_v5 }
 0x26a   : > { %v2613_v63 = vadd.f32 %v2564_v23, %v2298_v46  ;;  %v2302_v39 = vpop.f32.mrf.mxu1 }
 0x26b   : > { %v2567_v8 = vpop.f32.mrf.mxu2 }
 0x26c   : > { %v2649_v6 = vadd.f32 %v3930_v36, %v2613_v63 }
 0x26e   : > { %2681 = vst.msk [vmem:[%s3939_s30 + $0xa8] sm:$0xff] %vm1646_vm5, %v2649_v6 }
 0x26f   : > { %v2143_v49 = vpop.f32.mrf.mxu3 }
 0x270   : > { %v2301_v58 = vadd.f32 %v2300_v11, %v2143_v49 }
 0x272   : > { %v2614_v7 = vadd.f32 %v2567_v8, %v2301_v58  ;;  %v2305_v0 = vpop.f32.mrf.mxu1 }
 0x273   : > { %v2569_v31 = vpop.f32.mrf.mxu2 }
 0x274   : > { %v2650_v24 = vadd.f32 %v3930_v36, %v2614_v7  ;;  %v888_v16 = vpop.f32.mrf.mxu0 }
 0x276   : > { %2682 = vst.msk [vmem:[%s3939_s30 + $0xb0] sm:$0xff] %vm1646_vm5, %v2650_v24 }
 0x277   : > { %v2145_v40 = vpop.f32.mrf.mxu3 }
 0x278   : > { %v2303_v19 = vadd.f32 %v2302_v39, %v2145_v40 }
 0x27a   : > { %v2615_v18 = vadd.f32 %v2569_v31, %v2303_v19  ;;  %v2307_v20 = vpop.f32.mrf.mxu1 }
 0x27b   : > { %v2572_v33 = vpop.f32.mrf.mxu2 }
 0x27c   : > { %v2651_v9 = vadd.f32 %v3930_v36, %v2615_v18  ;;  %v890_v59 = vpop.f32.mrf.mxu0 }
 0x27e   : > { %2683 = vst.msk [vmem:[%s3939_s30 + $0xb8] sm:$0xff] %vm1646_vm5, %v2651_v9 }
 0x27f   : > { %v2148_v55 = vpop.f32.mrf.mxu3 }
 0x280   : > { %v2306_v25 = vadd.f32 %v2305_v0, %v2148_v55 }
 0x282   : > { %v2616_v26 = vadd.f32 %v2572_v33, %v2306_v25  ;;  %v2310_v32 = vpop.f32.mrf.mxu1 }
 0x283   : > { %v2574_v28 = vpop.f32.mrf.mxu2 }
 0x284   : > { %v2652_v29 = vadd.f32 %v3930_v36, %v2616_v26 }
 0x286   : > { %2684 = vst.msk [vmem:[%s3939_s30 + $0xc0] sm:$0xff] %vm1646_vm5, %v2652_v29 }
 0x287   : > { %v2150_v34 = vpop.f32.mrf.mxu3 }
 0x288   : > { %v2308_v35 = vadd.f32 %v2307_v20, %v2150_v34 }
 0x28a   : > { %v2617_v30 = vadd.f32 %v2574_v28, %v2308_v35  ;;  %v2312_v17 = vpop.f32.mrf.mxu1 }
 0x28b   : > { %v2577_v13 = vpop.f32.mrf.mxu2 }
 0x28c   : > { %v2653_v54 = vadd.f32 %v3930_v36, %v2617_v30 }
 0x28e   : > { %2685 = vst.msk [vmem:[%s3939_s30 + $0xc8] sm:$0xff] %vm1646_vm5, %v2653_v54 }
 0x28f   : > { %v2153_v27 = vpop.f32.mrf.mxu3 }
 0x290   : > { %v2311_v53 = vadd.f32 %v2310_v32, %v2153_v27 }
 0x292   : > { %v2618_v37 = vadd.f32 %v2577_v13, %v2311_v53  ;;  %v2315_v48 = vpop.f32.mrf.mxu1 }
 0x293   : > { %v2579_v56 = vpop.f32.mrf.mxu2 }
 0x294   : > { %v2654_v38 = vadd.f32 %v3930_v36, %v2618_v37 }
 0x296   : > { %2686 = vst.msk [vmem:[%s3939_s30 + $0xd0] sm:$0xff] %vm1646_vm5, %v2654_v38 }
 0x297   : > { %v2155_v42 = vpop.f32.mrf.mxu3 }
 0x298   : > { %v2313_v10 = vadd.f32 %v2312_v17, %v2155_v42 }
 0x29a   : > { %v2619_v43 = vadd.f32 %v2579_v56, %v2313_v10  ;;  %v2317_v45 = vpop.f32.mrf.mxu1 }
 0x29b   : > { %v2582_v50 = vpop.f32.mrf.mxu2 }
 0x29c   : > { %v2655_v12 = vadd.f32 %v3930_v36, %v2619_v43 }
 0x29e   : > { %2687 = vst.msk [vmem:[%s3939_s30 + $0xd8] sm:$0xff] %vm1646_vm5, %v2655_v12 }
 0x29f   : > { %v2158_v41 = vpop.f32.mrf.mxu3 }
 0x2a0   : > { %v2316_v14 = vadd.f32 %v2315_v48, %v2158_v41 }
 0x2a2   : > { %v2620_v44 = vadd.f32 %v2582_v50, %v2316_v14  ;;  %v2320_v1 = vpop.f32.mrf.mxu1 }
 0x2a3   : > { %v2584_v51 = vpop.f32.mrf.mxu2 }
 0x2a4   : > { %v2656_v47 = vadd.f32 %v3930_v36, %v2620_v44 }
 0x2a6   : > { %2688 = vst.msk [vmem:[%s3939_s30 + $0xe0] sm:$0xff] %vm1646_vm5, %v2656_v47 }
 0x2a7   : > { %v2160_v52 = vpop.f32.mrf.mxu3 }
 0x2a8   : > { %v2318_v57 = vadd.f32 %v2317_v45, %v2160_v52 }
 0x2aa   : > { %v2621_v60 = vadd.f32 %v2584_v51, %v2318_v57  ;;  %v2322_v21 = vpop.f32.mrf.mxu1 }
 0x2ab   : > { %v2587_v15 = vpop.f32.mrf.mxu2 }
 0x2ac   : > { %v2657_v61 = vadd.f32 %v3930_v36, %v2621_v60 }
 0x2ae   : > { %2689 = vst.msk [vmem:[%s3939_s30 + $0xe8] sm:$0xff] %vm1646_vm5, %v2657_v61 }
 0x2af   : > { %v2163_v62 = vpop.f32.mrf.mxu3 }
 0x2b0   : > { %v2321_v2 = vadd.f32 %v2320_v1, %v2163_v62 }
 0x2b2   : > { %v2622_v3 = vadd.f32 %v2587_v15, %v2321_v2 }
 0x2b3   : > { %v2589_v4 = vpop.f32.mrf.mxu2 }
 0x2b4   : > { %v2658_v22 = vadd.f32 %v3930_v36, %v2622_v3 }
 0x2b6   : > { %2690 = vst.msk [vmem:[%s3939_s30 + $0xf0] sm:$0xff] %vm1646_vm5, %v2658_v22 }
 0x2b7   : > { %v2165_v11 = vpop.f32.mrf.mxu3 }
 0x2b8   : > { %v2323_v23 = vadd.f32 %v2322_v21, %v2165_v11 }
 0x2ba   : > { %v2623_v5 = vadd.f32 %v2589_v4, %v2323_v23 }
 0x2bc   : > { %v2659_v46 = vadd.f32 %v3930_v36, %v2623_v5 }
 0x2be   : > { %2691 = vst.msk [vmem:[%s3939_s30 + $0xf8] sm:$0xff] %vm1646_vm5, %v2659_v46 }
 0x2bf   : > { %3239 = shalt.err (!%p3236_p5)
}
 0x2c0   : > { %s3295_s20 = smov 128   ;;  %s3296_s30 = smov 8  }
 0x2c1   : > { %3150 = dma.vmem_to_hbm [thread:$0]  (%p3392_p4), %s2709_s27, 4096, %s2711_s25, %s2693_s14, %s3295_s20, %s3295_s20, %s3296_s30  }
 0x2c2 PF: > { %p3156_p6 = scmp.ge.s32.totalorder %s3290_s16, 2  ;;  %s2725_s29 = sand.u32 1, %s3270_s4  }
 0x2c3   : > { %s2726_s17 = scalar_lea.sflag [#allocation3], %s2725_s29 }
 0x2c4   : > { %p3153_p7 = pnand %p3156_p6, %p3399_p8 }
 0x2c6   : > { %p3154_p9 = pneg %p3153_p7 }
 0x2c8   : > { %3265 = dma.done.wait (%p3154_p9), %s2726_s17, 4096  }
 0x2c9   : > { %3267 = vsyncadd (%p3154_p9), %s2726_s17, 4294963200  ;;  %s23_s16 = sadd.s32 1, %s3290_s16   ;;  %s4169_s4 = smov %s3274_s5 }
 0x2ca   : > { %p20_p10 = scmp.ge.s32.totalorder %s23_s16, 4   ;;  %s4170_s5 = smov %s3278_s13 }
 0x2cb   : > { %s4171_s13 = smov %s3405_s24  ;;  %s4172_s14 = smov %s3286_s15 }
 0x2cc   : > { %s4173_s15 = smov %s4175_s19  ;;  %22 = sbr.rel (!%p20_p10) target bundleno = 4 (0x4), region = 112 }
 0x2d1   :  { %2732 = vsyncpa [#allocation3], 1 }
 0x2d2   :  { %2734 = vsyncpa [#allocation3 + $0x1], 1 }

</bundles_post_ra>
